<compile_context>
chip_gen: v6e
topology: v6e:2x2x1
jax: 0.10.0
libtpu: 0.0.40
codegen_flags: <defaults>
</compile_context>

<pallas_src>
import numpy as np
import jax
import jax.numpy as jnp
from jax.experimental import pallas as pl
from jax.experimental.pallas import tpu as pltpu


def _policy_kernel(x_ref, bias_ref, w0_ref, rep_ref, w2_ref, out_ref):
    """One grid step == one batch tile, fully lane-dense.

    x_ref   : (tb, L*mdx)   flattened raw inputs (machine-major contiguous reshape)
    bias_ref: (tb, 32)      per-batch conv0 bias (BN0 shift + `cat` channels folded)
    w0_ref  : (L*mdx, L*32) block-diagonal conv0 weight with BN0 scale folded in
    rep_ref : (32, L*32)    replication matrix tiling the per-batch bias along L
    w2_ref  : (L*32, L)     block conv1 weight with BN1 scale folded in
    out_ref : (tb, L)       softmax over machines L
    """
    # conv0: one MXU matmul on the lane-dense slab; bias expansion rides the
    # (otherwise idle) MXU via a tiny second matmul instead of an XLU tile/broadcast.
    h = (jnp.dot(x_ref[...], w0_ref[...], preferred_element_type=jnp.float32)
         + jnp.dot(bias_ref[...], rep_ref[...], preferred_element_type=jnp.float32))
    # LeakyReLU (negative_slope = 0.01) on full 128-lane vregs.
    h = jnp.where(h > 0, h, 0.01 * h)
    # conv1 (Cout=1, BN1 scale folded) as a block matmul -> (tb, L) logits.
    z = jnp.dot(h, w2_ref[...], preferred_element_type=jnp.float32)
    # softmax over L; exact reciprocal + multiply (cheaper than a broadcast divide,
    # preserves the 1e-5 reference tolerance).
    m = jnp.max(z, axis=-1, keepdims=True)
    e = jnp.exp(z - m)
    inv = pl.reciprocal(jnp.sum(e, axis=-1, keepdims=True))
    out_ref[...] = (e * inv).astype(out_ref.dtype)


def _fold_params(raw_params, mdx, task_dim):
    """Fold eval-mode BatchNorms into the 1x1 conv weights (exact algebra)."""
    (g0, be0, m0, v0, g1, be1, m1, v1, w0, w1) = raw_params
    eps = 1e-5
    s0 = g0 / jnp.sqrt(v0 + eps)          # (mdx+T,)
    b0 = be0 - m0 * s0
    s1 = g1 / jnp.sqrt(v1 + eps)          # (32+T,)

    W0x, W0c = w0[:, :mdx], w0[:, mdx:]   # (32, mdx), (32, T)
    s0x, s0c = s0[:mdx], s0[mdx:]
    b0x, b0c = b0[:mdx], b0[mdx:]

    w0_eff = W0x * s0x[None, :]           # (32, mdx)  BN0 scale folded into conv0
    cat_w = W0c * s0c[None, :]            # (32, T)    effective weight on raw cat
    bias_const = W0x @ b0x + W0c @ b0c    # (32,)      BN0 shift folded into bias
    w1_eff = w1[0, :32] * s1[:32]         # (32,)      BN1 scale folded into conv1
    # The cat->conv1 path and BN1 shift are constant along L -> dropped (softmax-invariant).
    return w0_eff, cat_w, bias_const, w1_eff


def _round_up(x, m):
    return -(-x // m) * m


def model_v0_forward(x_raw, cat_raw, raw_params):
    """x_raw: (B, mdy, mdx), cat_raw: (B, task_dim) -> (B, mdy) softmax probs."""
    B, L, mdx = x_raw.shape
    T = cat_raw.shape[1]
    w0_eff, cat_w, bias_const, w1_eff = _fold_params(raw_params, mdx, T)
    f32 = jnp.float32

    # --- lane-dense operands built once in the wrapper (weight-sized, tiny) ---
    K, H = L * mdx, L * 32
    eye_l = jnp.eye(L, dtype=f32)
    # block-diagonal conv0 weight: (L*mdx, L*32), block (l,l) == w0_eff.T
    w0_bd = (eye_l[:, None, :, None] * w0_eff.T[None, :, None, :]).reshape(K, H)
    # per-batch (32,) bias -> per-(machine,channel) replication matrix: (32, L*32)
    rep = jnp.tile(jnp.eye(32, dtype=f32), (1, L))
    # block conv1 weight: (L*32, L), column l reads the 32 channels of machine l
    w2_bd = (eye_l[:, None, :] * w1_eff[None, :, None]).reshape(H, L)

    # per-batch conv0 bias (BN0 shift + broadcast `cat` channels): (B, 32)
    bias_all = (cat_raw.astype(f32) @ cat_w.T + bias_const[None, :]).astype(f32)
    # contiguous reshape: (B, L, mdx) -> (B, L*mdx); no transpose/concat/HBM copy.
    x_flat = x_raw.reshape(B, K).astype(f32)

    # --- batch tiling: big tiles amortize per-step overhead; keep >= 2 tiles for
    # --- B >= 9 so the "parallel" axis can be sharded across v7x's two TCs.
    MAX_TB = 1024
    if B <= 8:
        tb = B                                                   # single full-dim tile
    else:
        tb = min(MAX_TB, _round_up(_round_up(B, 2) // 2, 8))     # ~B/2, sublane-aligned
    Bp = _round_up(B, tb)
    if Bp != B:
        x_flat = jnp.pad(x_flat, ((0, Bp - B), (0, 0)))
        bias_all = jnp.pad(bias_all, ((0, Bp - B), (0, 0)))
    nb = Bp // tb

    out = pl.pallas_call(
        _policy_kernel,
        out_shape=jax.ShapeDtypeStruct((Bp, L), f32),
        grid_spec=pltpu.PrefetchScalarGridSpec(
            num_scalar_prefetch=0,
            grid=(nb,),
            in_specs=[
                pl.BlockSpec((tb, K), lambda i: (i, 0)),     # x slab (lane-dense)
                pl.BlockSpec((tb, 32), lambda i: (i, 0)),    # per-batch bias
                pl.BlockSpec((K, H), lambda i: (0, 0)),      # block-diag conv0 weight
                pl.BlockSpec((32, H), lambda i: (0, 0)),     # bias replication matrix
                pl.BlockSpec((H, L), lambda i: (0, 0)),      # block conv1 weight
            ],
            out_specs=pl.BlockSpec((tb, L), lambda i: (i, 0)),
        ),
        compiler_params=pltpu.CompilerParams(
            dimension_semantics=("parallel",)),
    )(x_flat, bias_all, w0_bd, rep, w2_bd)

    return out[:B]


def make_raw_params(key, mdx, task_dim):
    """Deterministic synthetic torch-like parameters (BN gamma/beta/mean/var, conv weights)."""
    C0 = mdx + task_dim
    C1 = 32 + task_dim
    ks = jax.random.split(key, 10)
    g0 = 1.0 + 0.1 * jax.random.normal(ks[0], (C0,), jnp.float32)
    be0 = 0.1 * jax.random.normal(ks[1], (C0,), jnp.float32)
    m0 = 0.1 * jax.random.normal(ks[2], (C0,), jnp.float32)
    v0 = jnp.abs(jax.random.normal(ks[3], (C0,), jnp.float32)) + 0.5
    g1 = 1.0 + 0.1 * jax.random.normal(ks[4], (C1,), jnp.float32)
    be1 = 0.1 * jax.random.normal(ks[5], (C1,), jnp.float32)
    m1 = 0.1 * jax.random.normal(ks[6], (C1,), jnp.float32)
    v1 = jnp.abs(jax.random.normal(ks[7], (C1,), jnp.float32)) + 0.5
    w0 = 0.2 * jax.random.normal(ks[8], (32, C0), jnp.float32)   # conv0 weight (k=1)
    w1 = 0.2 * jax.random.normal(ks[9], (1, C1), jnp.float32)    # conv1 weight (k=1)
    return (g0, be0, m0, v0, g1, be1, m1, v1, w0, w1)


def reference_forward(x_raw, cat_raw, raw_params):
    """Pure-JAX faithful replica of the torch forward (eval-mode BN), unfolded."""
    (g0, be0, m0, v0, g1, be1, m1, v1, w0, w1) = raw_params
    eps = 1e-5
    B, mdy, mdx = x_raw.shape
    T = cat_raw.shape[1]
    x = jnp.transpose(x_raw, (0, 2, 1))                               # (B, mdx, L)
    cat = jnp.broadcast_to(cat_raw[:, :, None], (B, T, mdy))          # (B, T, L)
    x0 = jnp.concatenate([x, cat], axis=1)                            # (B, C0, L)
    s0 = g0 / jnp.sqrt(v0 + eps); b0 = be0 - m0 * s0
    y = x0 * s0[None, :, None] + b0[None, :, None]
    h = jnp.einsum('oc,bcl->bol', w0, y)
    h = jnp.where(h > 0, h, 0.01 * h)
    u = jnp.concatenate([h, cat], axis=1)                             # (B, 32+T, L)
    s1 = g1 / jnp.sqrt(v1 + eps); b1 = be1 - m1 * s1
    v_ = u * s1[None, :, None] + b1[None, :, None]
    z = jnp.einsum('oc,bcl->bol', w1, v_)[:, 0, :]                    # (B, L)
    return jax.nn.softmax(z, axis=-1)


if __name__ == "__main__":
    B, mdy, mdx, task_dim = 2, 16, 8, 4   # machines_dims=(mdy, mdx)

    key = jax.random.PRNGKey(0)
    k_x, k_c, k_p = jax.random.split(key, 3)
    x_raw = jax.random.normal(k_x, (B, mdy, mdx), jnp.float32)     # (B, mdy, mdx)
    cat_raw = jax.random.normal(k_c, (B, task_dim), jnp.float32)   # (B, task_dim)
    raw_params = make_raw_params(k_p, mdx, task_dim)

    fwd = jax.jit(model_v0_forward)
    out = jax.block_until_ready(fwd(x_raw, cat_raw, raw_params))
    ref = reference_forward(x_raw, cat_raw, raw_params)
    assert out.shape == (B, mdy)
    assert np.allclose(np.asarray(out), np.asarray(ref), atol=1e-5, rtol=1e-4)
    assert np.allclose(np.asarray(out).sum(axis=-1), 1.0, atol=1e-5)

    # Exercise the padded / multi-tile ("parallel" over >=2 tiles) path.
    B2 = 37
    x2 = jax.random.normal(jax.random.PRNGKey(1), (B2, mdy, mdx), jnp.float32)
    c2 = jax.random.normal(jax.random.PRNGKey(2), (B2, task_dim), jnp.float32)
    out2 = jax.block_until_ready(jax.jit(model_v0_forward)(x2, c2, raw_params))
    ref2 = reference_forward(x2, c2, raw_params)
    assert out2.shape == (B2, mdy)
    assert np.allclose(np.asarray(out2), np.asarray(ref2), atol=1e-5, rtol=1e-4)

    print("KERNEL_OK")
</pallas_src>

<mosaic_0001>
module attributes {stable_mosaic.version = 11 : i64} {
  func.func @_policy_kernel(%arg0: i32, %arg1: memref<2x128xf32, #tpu.memory_space<vmem>>, %arg2: memref<2x32xf32, #tpu.memory_space<vmem>>, %arg3: memref<128x512xf32, #tpu.memory_space<vmem>>, %arg4: memref<32x512xf32, #tpu.memory_space<vmem>>, %arg5: memref<512x16xf32, #tpu.memory_space<vmem>>, %arg6: memref<2x16xf32, #tpu.memory_space<vmem>>) attributes {dimension_semantics = [#tpu.dimension_semantics<parallel>], iteration_bounds = array<i64: 1>, scalar_prefetch = 0 : i64, scratch_operands = 0 : i64, tpu.core_type = #tpu.core_type<tc>, window_params = [{transform_indices = @transform_0, window_bounds = array<i64: 2, 128>}, {transform_indices = @transform_1, window_bounds = array<i64: 2, 32>}, {pipeline_mode = #tpu.pipeline_mode<synchronous>, transform_indices = @transform_2, window_bounds = array<i64: 128, 512>}, {pipeline_mode = #tpu.pipeline_mode<synchronous>, transform_indices = @transform_3, window_bounds = array<i64: 32, 512>}, {pipeline_mode = #tpu.pipeline_mode<synchronous>, transform_indices = @transform_4, window_bounds = array<i64: 512, 16>}, {transform_indices = @transform_5, window_bounds = array<i64: 2, 16>}]} {
    %c0 = arith.constant 0 : index
    %c0_0 = arith.constant 0 : index
    %0 = vector.load %arg1[%c0, %c0_0] : memref<2x128xf32, #tpu.memory_space<vmem>>, vector<2x128xf32>
    %c0_1 = arith.constant 0 : index
    %c0_2 = arith.constant 0 : index
    %1 = vector.load %arg3[%c0_1, %c0_2] : memref<128x512xf32, #tpu.memory_space<vmem>>, vector<128x512xf32>
    %cst = arith.constant dense<0.000000e+00> : vector<2x512xf32>
    %2 = tpu.matmul %0, %1, %cst {dimension_numbers = #tpu.dot_dimension_numbers<[1], [0], [0], [1], [0, 0, 1, 1], [], []>} : vector<2x128xf32>, vector<128x512xf32>, vector<2x512xf32> -> vector<2x512xf32>
    %c0_3 = arith.constant 0 : index
    %c0_4 = arith.constant 0 : index
    %3 = vector.load %arg2[%c0_3, %c0_4] : memref<2x32xf32, #tpu.memory_space<vmem>>, vector<2x32xf32>
    %c0_5 = arith.constant 0 : index
    %c0_6 = arith.constant 0 : index
    %4 = vector.load %arg4[%c0_5, %c0_6] : memref<32x512xf32, #tpu.memory_space<vmem>>, vector<32x512xf32>
    %cst_7 = arith.constant dense<0.000000e+00> : vector<2x512xf32>
    %5 = tpu.matmul %3, %4, %cst_7 {dimension_numbers = #tpu.dot_dimension_numbers<[1], [0], [0], [1], [0, 0, 1, 1], [], []>} : vector<2x32xf32>, vector<32x512xf32>, vector<2x512xf32> -> vector<2x512xf32>
    %6 = arith.addf %2, %5 : vector<2x512xf32>
    %cst_8 = arith.constant 0.000000e+00 : f32
    %7 = vector.broadcast %cst_8 : f32 to vector<2x512xf32>
    %8 = arith.cmpf ogt, %6, %7 : vector<2x512xf32>
    %cst_9 = arith.constant 0.00999999977 : f32
    %9 = vector.broadcast %cst_9 : f32 to vector<2x512xf32>
    %10 = arith.mulf %9, %6 : vector<2x512xf32>
    %11 = arith.select %8, %6, %10 : vector<2x512xi1>, vector<2x512xf32>
    %c0_10 = arith.constant 0 : index
    %c0_11 = arith.constant 0 : index
    %12 = vector.load %arg5[%c0_10, %c0_11] : memref<512x16xf32, #tpu.memory_space<vmem>>, vector<512x16xf32>
    %cst_12 = arith.constant dense<0.000000e+00> : vector<2x16xf32>
    %13 = tpu.matmul %11, %12, %cst_12 {dimension_numbers = #tpu.dot_dimension_numbers<[1], [0], [0], [1], [0, 0, 1, 1], [], []>} : vector<2x512xf32>, vector<512x16xf32>, vector<2x16xf32> -> vector<2x16xf32>
    %cst_13 = arith.constant dense<0xFF800000> : vector<2xf32>
    %14 = vector.multi_reduction <maximumf>, %13, %cst_13 [1] : vector<2x16xf32> to vector<2xf32>
    %15 = vector.shape_cast %14 : vector<2xf32> to vector<2x1xf32>
    %16 = vector.broadcast %15 : vector<2x1xf32> to vector<2x16xf32>
    %17 = arith.subf %13, %16 : vector<2x16xf32>
    %18 = math.exp %17 : vector<2x16xf32>
    %cst_14 = arith.constant dense<0.000000e+00> : vector<2xf32>
    %19 = vector.multi_reduction <add>, %18, %cst_14 [1] : vector<2x16xf32> to vector<2xf32>
    %20 = vector.shape_cast %19 : vector<2xf32> to vector<2x1xf32>
    %21 = tpu.reciprocal %20 : vector<2x1xf32> -> vector<2x1xf32>
    %22 = vector.broadcast %21 : vector<2x1xf32> to vector<2x16xf32>
    %23 = arith.mulf %18, %22 : vector<2x16xf32>
    %c0_15 = arith.constant 0 : index
    %c0_16 = arith.constant 0 : index
    %24 = vector.load %arg6[%c0_15, %c0_16] : memref<2x16xf32, #tpu.memory_space<vmem>>, vector<2x16xf32>
    tpu.vector_store %arg6[%c0_15, %c0_16], %23 {strides = array<i32>} : memref<2x16xf32, #tpu.memory_space<vmem>>, vector<2x16xf32>,
    return
  }
  func.func @transform_0(%arg0: i32) -> (i32, i32) {
    %c0_i32 = arith.constant 0 : i32
    %c0_i32_0 = arith.constant 0 : i32
    return %arg0, %c0_i32 : i32, i32
  }
  func.func @transform_1(%arg0: i32) -> (i32, i32) {
    %c0_i32 = arith.constant 0 : i32
    %c0_i32_0 = arith.constant 0 : i32
    return %arg0, %c0_i32 : i32, i32
  }
  func.func @transform_2(%arg0: i32) -> (i32, i32) {
    %c0_i32 = arith.constant 0 : i32
    %c0_i32_0 = arith.constant 0 : i32
    %c0_i32_1 = arith.constant 0 : i32
    return %c0_i32, %c0_i32_0 : i32, i32
  }
  func.func @transform_3(%arg0: i32) -> (i32, i32) {
    %c0_i32 = arith.constant 0 : i32
    %c0_i32_0 = arith.constant 0 : i32
    %c0_i32_1 = arith.constant 0 : i32
    return %c0_i32, %c0_i32_0 : i32, i32
  }
  func.func @transform_4(%arg0: i32) -> (i32, i32) {
    %c0_i32 = arith.constant 0 : i32
    %c0_i32_0 = arith.constant 0 : i32
    %c0_i32_1 = arith.constant 0 : i32
    return %c0_i32, %c0_i32_0 : i32, i32
  }
  func.func @transform_5(%arg0: i32) -> (i32, i32) {
    %c0_i32 = arith.constant 0 : i32
    %c0_i32_0 = arith.constant 0 : i32
    return %arg0, %c0_i32 : i32, i32
  }
}

</mosaic_0001>

<bundles_post_ra>
// kernel: tile.9
= control target key start
LH: loop header
LB: loop body
LE: loop exit
PB: predicated region body
PF: predicated region fallthrough
CT: control target
= control target key end

     0   :  { %vm118_vm0 = vcmask 1043458   ;;  %s158_s6 = smov 3  ;;  %vm123_vm1 = vcmask 1045508   ;;  %vm128_vm2 = vcmask 1047558   ;;  %s161_s9 = smov 12  ;;  %vm3_vm3 = vcmask 261120   ;;  %s2648_s0 = inlined_call_operand.vmem [shape: f32[32,16,32], index: 0, kind: input, shape index: {}]   ;;  %s2649_s1 = inlined_call_operand.vmem [shape: f32[32,512], index: 1, kind: output, shape index: {}]  }
   0x1   :  { %v1268_v0 = vld [vmem:[%s2648_s0 + $0x103] ss:$16 sm:%s158_s6]   ;;  %s166_s10 = smov 48  ;;  %s171_s15 = smov 192  ;;  %v1223_v54 = vld [vmem:[%s2648_s0 + $0x80] ss:$4 sm:$0xff]  }
   0x2   :  { %v1269_v1 = vld [vmem:[%s2648_s0 + $0x103] ss:$16 sm:%s161_s9]   ;;  %s113_s16 = smov 3  ;;  %s116_s21 = smov 12  ;;  %vm132_vm4 = vcmask 1048320   ;;  %vm499_vm5 = vcmask 785920  }
   0x3   :  { %v1270_v2 = vld [vmem:[%s2648_s0 + $0x103] ss:$16 sm:%s166_s10]   ;;  %v164_v3 = vsel %vm118_vm0, %v1269_v1, %v1268_v0  ;;  %s121_s22 = smov 48  ;;  %s126_s27 = smov 192  ;;  %v1226_v0 = vld [vmem:[%s2648_s0 + $0xa0] ss:$4 sm:$0xff]  }
   0x4   :  { %v1271_v4 = vld [vmem:[%s2648_s0 + $0x103] ss:$16 sm:%s171_s15]   ;;  %v169_v6 = vsel %vm123_vm1, %v1270_v2, %v164_v3  ;;  %s181_s28 = smov 3  ;;  %s184_s4 = smov 12  ;;  %vm866_vm6 = vcmask 523520  }
   0x5   :  { %v1259_v5 = vld [vmem:[%s2648_s0 + $0x3] ss:$16 sm:%s113_s16]   ;;  %v174_v9 = vsel %vm128_vm2, %v1271_v4, %v169_v6  ;;  %s189_s5 = smov 48  ;;  %s1499_s6 = smov 96   ;;  %v1229_v6 = vld [vmem:[%s2648_s0 + $0xc0] ss:$4 sm:$0xff]  }
   0x6   :  { %v1260_v7 = vld [vmem:[%s2648_s0 + $0x3] ss:$16 sm:%s116_s21]   ;;  %175 = vrot.lane.b32.xlu1 %v174_v9, %s1499_s6  ;;  %s194_s9 = smov 192  ;;  %s135_s10 = smov 3 }
   0x7   :  { %v1261_v8 = vld [vmem:[%s2648_s0 + $0x3] ss:$16 sm:%s121_s22]   ;;  %v119_v10 = vsel %vm118_vm0, %v1260_v7, %v1259_v5  ;;  %s138_s15 = smov 12  ;;  %s143_s16 = smov 48 }
   0x8   :  { %v1262_v11 = vld [vmem:[%s2648_s0 + $0x3] ss:$16 sm:%s126_s27]   ;;  %v124_v13 = vsel %vm123_vm1, %v1261_v8, %v119_v10  ;;  %s148_s19 = smov 192  ;;  %s227_s20 = smov 3 }
   0x9   :  { %v1273_v12 = vld [vmem:[%s2648_s0 + $0x183] ss:$16 sm:%s181_s28]   ;;  %v129_v15 = vsel %vm128_vm2, %v1262_v11, %v124_v13  ;;  %s230_s25 = smov 12  ;;  %s235_s26 = smov 48  ;;  %v1283_v27 = vld [vmem:[%s2648_s0 + $0x87] ss:$16 sm:%s227_s20]  }
   0xa   :  { %v1274_v14 = vld [vmem:[%s2648_s0 + $0x183] ss:$16 sm:%s184_s4]   ;;  %130 = vrot.lane.b32.xlu0 %v129_v15, %s1499_s6  ;;  %s240_s29 = smov 192  ;;  %s204_s30 = smov 3 }
   0xb   :  { %v187_v16 = vsel %vm118_vm0, %v1274_v14, %v1273_v12  ;;  %v1275_v17 = vld [vmem:[%s2648_s0 + $0x183] ss:$16 sm:%s189_s5]   ;;  %v1284_v28 = vld [vmem:[%s2648_s0 + $0x87] ss:$16 sm:%s230_s25]   ;;  %s207_s7 = smov 12  ;;  %s212_s8 = smov 48 }
   0xc   :  { %v1276_v18 = vld [vmem:[%s2648_s0 + $0x183] ss:$16 sm:%s194_s9]   ;;  %v192_v19 = vsel %vm123_vm1, %v1275_v17, %v187_v16  ;;  %v233_v30 = vsel %vm118_vm0, %v1284_v28, %v1283_v27  ;;  %v1285_v31 = vld [vmem:[%s2648_s0 + $0x87] ss:$16 sm:%s235_s26]   ;;  %s217_s13 = smov 192  ;;  %s276_s17 = smov 12 }
   0xd   :  { %v1263_v20 = vld [vmem:[%s2648_s0 + $0x83] ss:$16 sm:%s135_s10]   ;;  %v197_v21 = vsel %vm128_vm2, %v1276_v18, %v192_v19  ;;  %v1286_v32 = vld [vmem:[%s2648_s0 + $0x87] ss:$16 sm:%s240_s29]   ;;  %v238_v33 = vsel %vm123_vm1, %v1285_v31, %v233_v30  ;;  %s281_s22 = smov 48  ;;  %s286_s23 = smov 192 }
   0xe   :  { %v1264_v22 = vld [vmem:[%s2648_s0 + $0x83] ss:$16 sm:%s138_s15]   ;;  %198 = vrot.lane.b32.xlu1 %v197_v21, %s1499_s6  ;;  %v243_v35 = vsel %vm128_vm2, %v1286_v32, %v238_v33  ;;  %s250_s26 = smov 3  ;;  %s253_s2 = smov 12  ;;  %v1232_v16 = vld [vmem:[%s2648_s0 + $0xe0] ss:$4 sm:$0xff]  }
   0xf   :  { %v1265_v23 = vld [vmem:[%s2648_s0 + $0x83] ss:$16 sm:%s143_s16]   ;;  %v141_v24 = vsel %vm118_vm0, %v1264_v22, %v1263_v20  ;;  %v1278_v34 = vld [vmem:[%s2648_s0 + $0x7] ss:$16 sm:%s204_s30]   ;;  %s273_s16 = smov 3  ;;  %s258_s3 = smov 48 }
  0x10   :  { %v1266_v25 = vld [vmem:[%s2648_s0 + $0x83] ss:$16 sm:%s148_s19]   ;;  %v146_v26 = vsel %vm123_vm1, %v1265_v23, %v141_v24  ;;  %v1279_v36 = vld [vmem:[%s2648_s0 + $0x7] ss:$16 sm:%s207_s7]   ;;  %s263_s9 = smov 192  ;;  %s319_s12 = smov 3 }
  0x11   :  { %v151_v29 = vsel %vm128_vm2, %v1266_v25, %v146_v26  ;;  %v1280_v37 = vld [vmem:[%s2648_s0 + $0x7] ss:$16 sm:%s212_s8]   ;;  %v210_v38 = vsel %vm118_vm0, %v1279_v36, %v1278_v34  ;;  %s327_s18 = smov 48  ;;  %s332_s19 = smov 192  ;;  %v1303_v56 = vld [vmem:[%s2648_s0 + $0x8b] ss:$16 sm:%s319_s12]  }
  0x12   :  { %152 = vrot.lane.b32.xlu0 %v151_v29, %s1499_s6  ;;  %244 = vrot.lane.b32.xlu1 %v243_v35, %s1499_s6  ;;  %v1281_v39 = vld [vmem:[%s2648_s0 + $0x7] ss:$16 sm:%s217_s13]   ;;  %v215_v40 = vsel %vm123_vm1, %v1280_v37, %v210_v38  ;;  %s322_s13 = smov 12  ;;  %s299_s29 = smov 12 }
  0x13   :  { %v1293_v41 = vld [vmem:[%s2648_s0 + $0x187] ss:$16 sm:%s273_s16]   ;;  %v220_v43 = vsel %vm128_vm2, %v1281_v39, %v215_v40  ;;  %v1304_v57 = vld [vmem:[%s2648_s0 + $0x8b] ss:$16 sm:%s322_s13]   ;;  %s304_s30 = smov 48  ;;  %s309_s11 = smov 192 }
  0x14   :  { %v1294_v42 = vld [vmem:[%s2648_s0 + $0x187] ss:$16 sm:%s276_s17]   ;;  %1224 = vst.msk [vmem:[%s2649_s1 + $0x20] ss:$8 sm:$0xf] %vm3_vm3, %v1223_v54   ;;  %v325_v59 = vsel %vm118_vm0, %v1304_v57, %v1303_v56  ;;  %s365_s14 = smov 3 }
  0x15   :  { %v279_v44 = vsel %vm118_vm0, %v1294_v42, %v1293_v41  ;;  %v1295_v45 = vld [vmem:[%s2648_s0 + $0x187] ss:$16 sm:%s281_s22]   ;;  %s296_s22 = smov 3  ;;  %1225 = vst.msk [vmem:[%s2649_s1 + $0x1] ss:$8 sm:$0xf0] %vm3_vm3, %v1223_v54  }
  0x16   :  { %v1296_v46 = vld [vmem:[%s2648_s0 + $0x187] ss:$16 sm:%s286_s23]   ;;  %221 = vrot.lane.b32.xlu0 %v220_v43, %s1499_s6  ;;  %v284_v47 = vsel %vm123_vm1, %v1295_v45, %v279_v44  ;;  %s368_s15 = smov 12  ;;  %s378_s23 = smov 192  ;;  %v2_v31 = vld [vmem:[%s2648_s0] ss:$4 sm:$0xff]  }
  0x17   :  { %v1288_v48 = vld [vmem:[%s2648_s0 + $0x107] ss:$16 sm:%s250_s26]   ;;  %v289_v49 = vsel %vm128_vm2, %v1296_v46, %v284_v47  ;;  %v1305_v60 = vld [vmem:[%s2648_s0 + $0x8b] ss:$16 sm:%s327_s18]   ;;  %s350_s10 = smov 48  ;;  %s396_s16 = smov 48 }
  0x18   :  { %v1289_v50 = vld [vmem:[%s2648_s0 + $0x107] ss:$16 sm:%s253_s2]   ;;  %290 = vrot.lane.b32.xlu1 %v289_v49, %s1499_s6  ;;  %v330_v62 = vsel %vm123_vm1, %v1305_v60, %v325_v59  ;;  %1227 = vst.msk [vmem:[%s2649_s1 + $0x22] ss:$8 sm:$0xf] %vm3_vm3, %v1226_v0   ;;  %s424_s2 = smov 192 }
  0x19   :  { %v1290_v51 = vld [vmem:[%s2648_s0 + $0x107] ss:$16 sm:%s258_s3]   ;;  %v256_v52 = vsel %vm118_vm0, %v1289_v50, %v1288_v48  ;;  %v1306_v61 = vld [vmem:[%s2648_s0 + $0x8b] ss:$16 sm:%s332_s19]   ;;  %s355_s19 = smov 192  ;;  %s401_s21 = smov 192 }
  0x1a   :  { %v1291_v53 = vld [vmem:[%s2648_s0 + $0x107] ss:$16 sm:%s263_s9]   ;;  %v261_v55 = vsel %vm123_vm1, %v1290_v51, %v256_v52  ;;  %v1298_v63 = vld [vmem:[%s2648_s0 + $0xb] ss:$16 sm:%s296_s22]   ;;  %v335_v1 = vsel %vm128_vm2, %v1306_v61, %v330_v62  ;;  %s373_s22 = smov 48  ;;  %s345_s9 = smov 12 }
  0x1b   :  { %v266_v58 = vsel %vm128_vm2, %v1291_v53, %v261_v55  ;;  %v1299_v2 = vld [vmem:[%s2648_s0 + $0xb] ss:$16 sm:%s299_s29]   ;;  %1228 = vst.msk [vmem:[%s2649_s1 + $0x3] ss:$8 sm:$0xf0] %vm3_vm3, %v1226_v0   ;;  %s457_s24 = smov 3 }
  0x1c   :  { %267 = vrot.lane.b32.xlu0 %v266_v58, %s1499_s6  ;;  %v1300_v3 = vld [vmem:[%s2648_s0 + $0xb] ss:$16 sm:%s304_s30]   ;;  %336 = vrot.lane.b32.xlu1 %v335_v1, %s1499_s6  ;;  %v302_v4 = vsel %vm118_vm0, %v1299_v2, %v1298_v63  ;;  %s342_s30 = smov 3  ;;  %s460_s25 = smov 12 }
  0x1d   :  { %v1301_v5 = vld [vmem:[%s2648_s0 + $0xb] ss:$16 sm:%s309_s11]   ;;  %v307_v7 = vsel %vm123_vm1, %v1300_v3, %v302_v4  ;;  %1230 = vst.msk [vmem:[%s2649_s1 + $0x24] ss:$8 sm:$0xf] %vm3_vm3, %v1229_v6   ;;  %s465_s3 = smov 48 }
  0x1e   :  { %v1313_v8 = vld [vmem:[%s2648_s0 + $0x18b] ss:$16 sm:%s365_s14]   ;;  %1231 = vst.msk [vmem:[%s2649_s1 + $0x5] ss:$8 sm:$0xf0] %vm3_vm3, %v1229_v6   ;;  %v312_v10 = vsel %vm128_vm2, %v1301_v5, %v307_v7  ;;  %s470_s4 = smov 192 }
  0x1f   :  { %v1314_v9 = vld [vmem:[%s2648_s0 + $0x18b] ss:$16 sm:%s368_s15]   ;;  %1233 = vst.msk [vmem:[%s2649_s1 + $0x26] ss:$8 sm:$0xf] %vm3_vm3, %v1232_v16   ;;  %s391_s15 = smov 12 }
  0x20   :  { %v371_v11 = vsel %vm118_vm0, %v1314_v9, %v1313_v8  ;;  %v1315_v12 = vld [vmem:[%s2648_s0 + $0x18b] ss:$16 sm:%s373_s22]   ;;  %313 = vrot.lane.b32.xlu0 %v312_v10, %s1499_s6  ;;  %s411_s22 = smov 3  ;;  %1234 = vst.msk [vmem:[%s2649_s1 + $0x7] ss:$8 sm:$0xf0] %vm3_vm3, %v1232_v16  }
  0x21   :  { %v1316_v13 = vld [vmem:[%s2648_s0 + $0x18b] ss:$16 sm:%s378_s23]   ;;  %v376_v14 = vsel %vm123_vm1, %v1315_v12, %v371_v11  ;;  %s414_s23 = smov 12  ;;  %v1323_v23 = vld [vmem:[%s2648_s0 + $0x8f] ss:$16 sm:%s411_s22]   ;;  %s434_s12 = smov 3 }
  0x22   :  { %v1308_v15 = vld [vmem:[%s2648_s0 + $0x10b] ss:$16 sm:%s342_s30]   ;;  %v381_v17 = vsel %vm128_vm2, %v1316_v13, %v376_v14  ;;  %s419_s30 = smov 48  ;;  %v1324_v24 = vld [vmem:[%s2648_s0 + $0x8f] ss:$16 sm:%s414_s23]   ;;  %s442_s20 = smov 48 }
  0x23   :  { %v1309_v18 = vld [vmem:[%s2648_s0 + $0x10b] ss:$16 sm:%s345_s9]   ;;  %382 = vrot.lane.b32.xlu1 %v381_v17, %s1499_s6  ;;  %v417_v26 = vsel %vm118_vm0, %v1324_v24, %v1323_v23  ;;  %4 = vst.msk [vmem:[%s2649_s1] ss:$8 sm:$0xf] %vm3_vm3, %v2_v31   ;;  %s447_s29 = smov 192 }
  0x24   :  { %v1310_v19 = vld [vmem:[%s2648_s0 + $0x10b] ss:$16 sm:%s350_s10]   ;;  %v348_v20 = vsel %vm118_vm0, %v1309_v18, %v1308_v15  ;;  %s388_s10 = smov 3  ;;  %v1325_v27 = vld [vmem:[%s2648_s0 + $0x8f] ss:$16 sm:%s419_s30]   ;;  %s515_s13 = smov 192 }
  0x25   :  { %v1311_v21 = vld [vmem:[%s2648_s0 + $0x10b] ss:$16 sm:%s355_s19]   ;;  %v353_v22 = vsel %vm123_vm1, %v1310_v19, %v348_v20  ;;  %v1326_v28 = vld [vmem:[%s2648_s0 + $0x8f] ss:$16 sm:%s424_s2]   ;;  %v422_v29 = vsel %vm123_vm1, %v1325_v27, %v417_v26  ;;  %s437_s19 = smov 12  ;;  %s483_s27 = smov 12 }
  0x26   :  { %v358_v25 = vsel %vm128_vm2, %v1311_v21, %v353_v22  ;;  %v1318_v30 = vld [vmem:[%s2648_s0 + $0xf] ss:$16 sm:%s388_s10]   ;;  %v427_v32 = vsel %vm128_vm2, %v1326_v28, %v422_v29  ;;  %1213 = vst.msk [vmem:[%s2649_s1 - $0x1f] ss:$8 sm:$0xf0] %vm3_vm3, %v2_v31   ;;  %s488_s28 = smov 48 }
  0x27   :  { %359 = vrot.lane.b32.xlu0 %v358_v25, %s1499_s6  ;;  %v1319_v33 = vld [vmem:[%s2648_s0 + $0xf] ss:$16 sm:%s391_s15]   ;;  %428 = vrot.lane.b32.xlu1 %v427_v32, %s1499_s6  ;;  %s493_s9 = smov 192  ;;  %s548_s11 = smov 3 }
  0x28   :  { %v1320_v34 = vld [vmem:[%s2648_s0 + $0xf] ss:$16 sm:%s396_s16]   ;;  %v394_v35 = vsel %vm118_vm0, %v1319_v33, %v1318_v30  ;;  %v1214_v37 = vld [vmem:[%s2648_s0 + $0x20] ss:$4 sm:$0xff]   ;;  %s528_s7 = smov 12  ;;  %s533_s8 = smov 48 }
  0x29   :  { %v1321_v36 = vld [vmem:[%s2648_s0 + $0xf] ss:$16 sm:%s401_s21]   ;;  %v399_v38 = vsel %vm123_vm1, %v1320_v34, %v394_v35  ;;  %1215 = vst.msk [vmem:[%s2649_s1 + $0x2] ss:$8 sm:$0xf] %vm3_vm3, %v1214_v37   ;;  %s538_s16 = smov 192 }
  0x2a   :  { %v1333_v39 = vld [vmem:[%s2648_s0 + $0x18f] ss:$16 sm:%s457_s24]   ;;  %1216 = vst.msk [vmem:[%s2649_s1 - $0x1d] ss:$8 sm:$0xf0] %vm3_vm3, %v1214_v37   ;;  %v404_v41 = vsel %vm128_vm2, %v1321_v36, %v399_v38  ;;  %s574_s14 = smov 12 }
  0x2b   :  { %v1334_v40 = vld [vmem:[%s2648_s0 + $0x18f] ss:$16 sm:%s460_s25]   ;;  %405 = vrot.lane.b32.xlu0 %v404_v41, %s1499_s6  ;;  %v1217_v47 = vld [vmem:[%s2648_s0 + $0x40] ss:$4 sm:$0xff]   ;;  %s1500_s25 = smov 64   ;;  %s579_s15 = smov 48 }
  0x2c   :  { %v463_v42 = vsel %vm118_vm0, %v1334_v40, %v1333_v39  ;;  %v1335_v43 = vld [vmem:[%s2648_s0 + $0x18f] ss:$16 sm:%s465_s3]   ;;  %s502_s3 = smov 3  ;;  %1218 = vst.msk [vmem:[%s2649_s1 + $0x4] ss:$8 sm:$0xf] %vm3_vm3, %v1217_v47  }
  0x2d   :  { %v1336_v44 = vld [vmem:[%s2648_s0 + $0x18f] ss:$16 sm:%s470_s4]   ;;  %v468_v45 = vsel %vm123_vm1, %v1335_v43, %v463_v42  ;;  %s505_s4 = smov 12  ;;  %1219 = vst.msk [vmem:[%s2649_s1 - $0x1b] ss:$8 sm:$0xf0] %vm3_vm3, %v1217_v47  }
  0x2e   :  { %v1328_v46 = vld [vmem:[%s2648_s0 + $0x10f] ss:$16 sm:%s434_s12]   ;;  %v473_v48 = vsel %vm128_vm2, %v1336_v44, %v468_v45  ;;  %s510_s12 = smov 48  ;;  %v1220_v53 = vld [vmem:[%s2648_s0 + $0x60] ss:$4 sm:$0xff]   ;;  %s584_s24 = smov 192 }
  0x2f   :  { %v1329_v49 = vld [vmem:[%s2648_s0 + $0x10f] ss:$16 sm:%s437_s19]   ;;  %474 = vrot.lane.b32.xlu1 %v473_v48, %s1499_s6  ;;  %1221 = vst.msk [vmem:[%s2649_s1 + $0x6] ss:$8 sm:$0xf] %vm3_vm3, %v1220_v53   ;;  %s556_s19 = smov 48 }
  0x30   :  { %v1330_v50 = vld [vmem:[%s2648_s0 + $0x10f] ss:$16 sm:%s442_s20]   ;;  %v440_v51 = vsel %vm118_vm0, %v1329_v49, %v1328_v46  ;;  %s480_s20 = smov 3  ;;  %v1342_v55 = vld [vmem:[%s2648_s0 + $0x82] ss:$16 sm:%s502_s3]   ;;  %s620_s22 = smov 12 }
  0x31   :  { %v1331_v52 = vld [vmem:[%s2648_s0 + $0x10f] ss:$16 sm:%s447_s29]   ;;  %v445_v54 = vsel %vm123_vm1, %v1330_v50, %v440_v51  ;;  %v1343_v56 = vld [vmem:[%s2648_s0 + $0x82] ss:$16 sm:%s505_s4]   ;;  %s607_s29 = smov 192  ;;  %s625_s23 = smov 48 }
  0x32   :  { %1222 = vst.msk [vmem:[%s2649_s1 - $0x19] ss:$8 sm:$0xf0] %vm3_vm3, %v1220_v53   ;;  %v450_v57 = vsel %vm128_vm2, %v1331_v52, %v445_v54  ;;  %v508_v58 = vsel %vm118_vm0, %v1343_v56, %v1342_v55  ;;  %v1344_v59 = vld [vmem:[%s2648_s0 + $0x82] ss:$16 sm:%s510_s12]   ;;  %s551_s12 = smov 12 }
  0x33   :  { %v1345_v60 = vld [vmem:[%s2648_s0 + $0x82] ss:$16 sm:%s515_s13]   ;;  %451 = vrot.lane.b32.xlu0 %v450_v57, %s1499_s6  ;;  %v513_v61 = vsel %vm123_vm1, %v1344_v59, %v508_v58  ;;  %v1247_v63 = vld [vmem:[%s2648_s0 + $0x180] ss:$4 sm:$0xff]   ;;  %s630_s4 = smov 192  ;;  %s666_s2 = smov 12 }
  0x34   :  { %v1338_v62 = vld [vmem:[%s2648_s0 + $0x2] ss:$16 sm:%s480_s20]   ;;  %v518_v0 = vsel %vm128_vm2, %v1345_v60, %v513_v61  ;;  %s561_s20 = smov 192  ;;  %1248 = vst.msk [vmem:[%s2649_s1 + $0x60] ss:$8 sm:$0xf] %vm3_vm3, %v1247_v63  }
  0x35   :  { %v1339_v1 = vld [vmem:[%s2648_s0 + $0x2] ss:$16 sm:%s483_s27]   ;;  %1249 = vst.msk [vmem:[%s2649_s1 + $0x41] ss:$8 sm:$0xf0] %vm3_vm3, %v1247_v63   ;;  %519 = vrot.lane.b32.xlu1 %v518_v0, %s1500_s25  ;;  %s671_s3 = smov 48 }
  0x36   :  { %v1340_v2 = vld [vmem:[%s2648_s0 + $0x2] ss:$16 sm:%s488_s28]   ;;  %v486_v3 = vsel %vm118_vm0, %v1339_v1, %v1338_v62  ;;  %s525_s28 = smov 3  ;;  %v1250_v5 = vld [vmem:[%s2648_s0 + $0x1a0] ss:$4 sm:$0xff]   ;;  %s740_s21 = smov 48 }
  0x37   :  { %v1341_v4 = vld [vmem:[%s2648_s0 + $0x2] ss:$16 sm:%s493_s9]   ;;  %v491_v6 = vsel %vm123_vm1, %v1340_v2, %v486_v3  ;;  %1251 = vst.msk [vmem:[%s2649_s1 + $0x62] ss:$8 sm:$0xf] %vm3_vm3, %v1250_v5   ;;  %s653_s9 = smov 192 }
  0x38   :  { %v1352_v7 = vld [vmem:[%s2648_s0 + $0x182] ss:$16 sm:%s548_s11]   ;;  %1252 = vst.msk [vmem:[%s2649_s1 + $0x43] ss:$8 sm:$0xf0] %vm3_vm3, %v1250_v5   ;;  %v496_v9 = vsel %vm128_vm2, %v1341_v4, %v491_v6  ;;  %s709_s26 = smov 3 }
  0x39   :  { %v1353_v8 = vld [vmem:[%s2648_s0 + $0x182] ss:$16 sm:%s551_s12]   ;;  %497 = vrot.lane.b32.xlu0 %v496_v9, %s1500_s25  ;;  %v1253_v15 = vld [vmem:[%s2648_s0 + $0x1c0] ss:$4 sm:$0xff]   ;;  %s676_s12 = smov 192  ;;  %s778_s11 = smov 3 }
  0x3a   :  { %v554_v10 = vsel %vm118_vm0, %v1353_v8, %v1352_v7  ;;  %v1354_v11 = vld [vmem:[%s2648_s0 + $0x182] ss:$16 sm:%s556_s19]   ;;  %s594_s19 = smov 3  ;;  %1254 = vst.msk [vmem:[%s2649_s1 + $0x64] ss:$8 sm:$0xf] %vm3_vm3, %v1253_v15  }
  0x3b   :  { %v1355_v12 = vld [vmem:[%s2648_s0 + $0x182] ss:$16 sm:%s561_s20]   ;;  %v559_v13 = vsel %vm123_vm1, %v1354_v11, %v554_v10  ;;  %s597_s20 = smov 12  ;;  %1255 = vst.msk [vmem:[%s2649_s1 + $0x45] ss:$8 sm:$0xf0] %vm3_vm3, %v1253_v15  }
  0x3c   :  { %v1347_v14 = vld [vmem:[%s2648_s0 + $0x102] ss:$16 sm:%s525_s28]   ;;  %v564_v16 = vsel %vm128_vm2, %v1355_v12, %v559_v13  ;;  %s602_s28 = smov 48  ;;  %v1256_v21 = vld [vmem:[%s2648_s0 + $0x1e0] ss:$4 sm:$0xff]   ;;  %s786_s17 = smov 48 }
  0x3d   :  { %v1348_v17 = vld [vmem:[%s2648_s0 + $0x102] ss:$16 sm:%s528_s7]   ;;  %565 = vrot.lane.b32.xlu1 %v564_v16, %s1500_s25  ;;  %1257 = vst.msk [vmem:[%s2649_s1 + $0x66] ss:$8 sm:$0xf] %vm3_vm3, %v1256_v21   ;;  %s791_s18 = smov 192 }
  0x3e   :  { %v1349_v18 = vld [vmem:[%s2648_s0 + $0x102] ss:$16 sm:%s533_s8]   ;;  %v531_v19 = vsel %vm118_vm0, %v1348_v17, %v1347_v14  ;;  %s571_s8 = smov 3  ;;  %v1362_v23 = vld [vmem:[%s2648_s0 + $0x86] ss:$16 sm:%s594_s19]   ;;  %s758_s27 = smov 12 }
  0x3f   :  { %v1350_v20 = vld [vmem:[%s2648_s0 + $0x102] ss:$16 sm:%s538_s16]   ;;  %v536_v22 = vsel %vm123_vm1, %v1349_v18, %v531_v19  ;;  %v1363_v24 = vld [vmem:[%s2648_s0 + $0x86] ss:$16 sm:%s597_s20]   ;;  %s699_s16 = smov 192  ;;  %s832_s13 = smov 48 }
  0x40   :  { %1258 = vst.msk [vmem:[%s2649_s1 + $0x47] ss:$8 sm:$0xf0] %vm3_vm3, %v1256_v21   ;;  %v541_v25 = vsel %vm128_vm2, %v1350_v20, %v536_v22  ;;  %v600_v26 = vsel %vm118_vm0, %v1363_v24, %v1362_v23  ;;  %v1364_v27 = vld [vmem:[%s2648_s0 + $0x86] ss:$16 sm:%s602_s28]   ;;  %s640_s28 = smov 3 }
  0x41   :  { %v1365_v28 = vld [vmem:[%s2648_s0 + $0x86] ss:$16 sm:%s607_s29]   ;;  %542 = vrot.lane.b32.xlu0 %v541_v25, %s1500_s25  ;;  %v605_v29 = vsel %vm123_vm1, %v1364_v27, %v600_v26  ;;  %s643_s29 = smov 12  ;;  %v1235_v31 = vld [vmem:[%s2648_s0 + $0x100] ss:$4 sm:$0xff]   ;;  %s877_s6 = smov 48 }
  0x42   :  { %v1357_v30 = vld [vmem:[%s2648_s0 + $0x6] ss:$16 sm:%s571_s8]   ;;  %v610_v32 = vsel %vm128_vm2, %v1365_v28, %v605_v29  ;;  %s648_s8 = smov 48  ;;  %1236 = vst.msk [vmem:[%s2649_s1 + $0x40] ss:$8 sm:$0xf] %vm3_vm3, %v1235_v31  }
  0x43   :  { %v1358_v33 = vld [vmem:[%s2648_s0 + $0x6] ss:$16 sm:%s574_s14]   ;;  %1237 = vst.msk [vmem:[%s2649_s1 + $0x21] ss:$8 sm:$0xf0] %vm3_vm3, %v1235_v31   ;;  %611 = vrot.lane.b32.xlu1 %v610_v32, %s1500_s25  ;;  %s837_s14 = smov 192 }
  0x44   :  { %v1359_v34 = vld [vmem:[%s2648_s0 + $0x6] ss:$16 sm:%s579_s15]   ;;  %v577_v35 = vsel %vm118_vm0, %v1358_v33, %v1357_v30  ;;  %s617_s15 = smov 3  ;;  %v1238_v37 = vld [vmem:[%s2648_s0 + $0x120] ss:$4 sm:$0xff]   ;;  %s882_s10 = smov 192 }
  0x45   :  { %v1360_v36 = vld [vmem:[%s2648_s0 + $0x6] ss:$16 sm:%s584_s24]   ;;  %v582_v38 = vsel %vm123_vm1, %v1359_v34, %v577_v35  ;;  %1239 = vst.msk [vmem:[%s2649_s1 + $0x42] ss:$8 sm:$0xf] %vm3_vm3, %v1238_v37   ;;  %s855_s19 = smov 48 }
  0x46   :  { %v1372_v39 = vld [vmem:[%s2648_s0 + $0x186] ss:$16 sm:%s640_s28]   ;;  %1240 = vst.msk [vmem:[%s2649_s1 + $0x23] ss:$8 sm:$0xf0] %vm3_vm3, %v1238_v37   ;;  %v587_v41 = vsel %vm128_vm2, %v1360_v36, %v582_v38  ;;  %s763_s28 = smov 48 }
  0x47   :  { %v1373_v40 = vld [vmem:[%s2648_s0 + $0x186] ss:$16 sm:%s643_s29]   ;;  %588 = vrot.lane.b32.xlu0 %v587_v41, %s1500_s25  ;;  %v1241_v47 = vld [vmem:[%s2648_s0 + $0x140] ss:$4 sm:$0xff]   ;;  %s814_s29 = smov 192  ;;  %s860_s24 = smov 192 }
  0x48   :  { %v646_v42 = vsel %vm118_vm0, %v1373_v40, %v1372_v39  ;;  %v1374_v43 = vld [vmem:[%s2648_s0 + $0x186] ss:$16 sm:%s648_s8]   ;;  %s686_s8 = smov 3  ;;  %1242 = vst.msk [vmem:[%s2649_s1 + $0x44] ss:$8 sm:$0xf] %vm3_vm3, %v1241_v47  }
  0x49   :  { %v1375_v44 = vld [vmem:[%s2648_s0 + $0x186] ss:$16 sm:%s653_s9]   ;;  %v651_v45 = vsel %vm123_vm1, %v1374_v43, %v646_v42  ;;  %s689_s9 = smov 12  ;;  %1243 = vst.msk [vmem:[%s2649_s1 + $0x25] ss:$8 sm:$0xf0] %vm3_vm3, %v1241_v47  }
  0x4a   :  { %v1367_v46 = vld [vmem:[%s2648_s0 + $0x106] ss:$16 sm:%s617_s15]   ;;  %v656_v48 = vsel %vm128_vm2, %v1375_v44, %v651_v45  ;;  %s694_s15 = smov 48  ;;  %v1244_v53 = vld [vmem:[%s2648_s0 + $0x160] ss:$4 sm:$0xff]   ;;  %s928_s5 = smov 192 }
  0x4b   :  { %v1368_v49 = vld [vmem:[%s2648_s0 + $0x106] ss:$16 sm:%s620_s22]   ;;  %657 = vrot.lane.b32.xlu1 %v656_v48, %s1500_s25  ;;  %1245 = vst.msk [vmem:[%s2649_s1 + $0x46] ss:$8 sm:$0xf] %vm3_vm3, %v1244_v53   ;;  %s745_s22 = smov 192 }
  0x4c   :  { %v1369_v50 = vld [vmem:[%s2648_s0 + $0x106] ss:$16 sm:%s625_s23]   ;;  %v623_v51 = vsel %vm118_vm0, %v1368_v49, %v1367_v46  ;;  %s663_s23 = smov 3  ;;  %v1382_v55 = vld [vmem:[%s2648_s0 + $0x8a] ss:$16 sm:%s686_s8]   ;;  %s824_s8 = smov 3 }
  0x4d   :  { %v1370_v52 = vld [vmem:[%s2648_s0 + $0x106] ss:$16 sm:%s630_s4]   ;;  %v628_v54 = vsel %vm123_vm1, %v1369_v50, %v623_v51  ;;  %v1383_v56 = vld [vmem:[%s2648_s0 + $0x8a] ss:$16 sm:%s689_s9]   ;;  %s722_s9 = smov 192  ;;  %s768_s4 = smov 192 }
  0x4e   :  { %1246 = vst.msk [vmem:[%s2649_s1 + $0x27] ss:$8 sm:$0xf0] %vm3_vm3, %v1244_v53   ;;  %v633_v57 = vsel %vm128_vm2, %v1370_v52, %v628_v54  ;;  %v692_v58 = vsel %vm118_vm0, %v1383_v56, %v1382_v55  ;;  %v1384_v59 = vld [vmem:[%s2648_s0 + $0x8a] ss:$16 sm:%s694_s15]   ;;  %s732_s15 = smov 3 }
  0x4f   :  { %v1385_v60 = vld [vmem:[%s2648_s0 + $0x8a] ss:$16 sm:%s699_s16]   ;;  %634 = vrot.lane.b32.xlu0 %v633_v57, %s1500_s25  ;;  %v697_v61 = vsel %vm123_vm1, %v1384_v59, %v692_v58  ;;  %s735_s16 = smov 12  ;;  %s1501_s7 = smov 32  }
  0x50   :  { %v1377_v62 = vld [vmem:[%s2648_s0 + $0xa] ss:$16 sm:%s663_s23]   ;;  %v702_v63 = vsel %vm128_vm2, %v1385_v60, %v697_v61  ;;  %v1402_v19 = vld [vmem:[%s2648_s0 + $0x8e] ss:$16 sm:%s778_s11]   ;;  %s809_s23 = smov 48  ;;  %s905_s20 = smov 192 }
  0x51   :  { %v1378_v0 = vld [vmem:[%s2648_s0 + $0xa] ss:$16 sm:%s666_s2]   ;;  %703 = vrot.lane.b32.xlu1 %v702_v63, %s1500_s25  ;;  %s712_s2 = smov 12  ;;  %s974_s30 = smov 192 }
  0x52   :  { %v1379_v1 = vld [vmem:[%s2648_s0 + $0xa] ss:$16 sm:%s671_s3]   ;;  %v669_v2 = vsel %vm118_vm0, %v1378_v0, %v1377_v62  ;;  %s717_s3 = smov 48  ;;  %v1404_v23 = vld [vmem:[%s2648_s0 + $0x8e] ss:$16 sm:%s786_s17]   ;;  %s801_s17 = smov 3 }
  0x53   :  { %v1380_v3 = vld [vmem:[%s2648_s0 + $0xa] ss:$16 sm:%s676_s12]   ;;  %v674_v4 = vsel %vm123_vm1, %v1379_v1, %v669_v2  ;;  %s781_s12 = smov 12  ;;  %v1405_v24 = vld [vmem:[%s2648_s0 + $0x8e] ss:$16 sm:%s791_s18]   ;;  %s850_s18 = smov 12 }
  0x54   :  { %v1392_v5 = vld [vmem:[%s2648_s0 + $0x18a] ss:$16 sm:%s732_s15]   ;;  %v679_v7 = vsel %vm128_vm2, %v1380_v3, %v674_v4  ;;  %v1403_v20 = vld [vmem:[%s2648_s0 + $0x8e] ss:$16 sm:%s781_s12]   ;;  %s900_s15 = smov 48  ;;  %s946_s11 = smov 48 }
  0x55   :  { %v1393_v6 = vld [vmem:[%s2648_s0 + $0x18a] ss:$16 sm:%s735_s16]   ;;  %680 = vrot.lane.b32.xlu0 %v679_v7, %s1500_s25  ;;  %v784_v22 = vsel %vm118_vm0, %v1403_v20, %v1402_v19  ;;  %s951_s16 = smov 192  ;;  %s997_s12 = smov 192 }
  0x56   :  { %v738_v8 = vsel %vm118_vm0, %v1393_v6, %v1392_v5  ;;  %v1394_v9 = vld [vmem:[%s2648_s0 + $0x18a] ss:$16 sm:%s740_s21]   ;;  %s755_s21 = smov 3  ;;  %v789_v25 = vsel %vm123_vm1, %v1404_v23, %v784_v22  ;;  %v1398_v28 = vld [vmem:[%s2648_s0 + $0xe] ss:$16 sm:%s758_s27]   ;;  %s915_s27 = smov 3 }
  0x57   :  { %v1395_v10 = vld [vmem:[%s2648_s0 + $0x18a] ss:$16 sm:%s745_s22]   ;;  %v743_v11 = vsel %vm123_vm1, %v1394_v9, %v738_v8  ;;  %v1397_v26 = vld [vmem:[%s2648_s0 + $0xe] ss:$16 sm:%s755_s21]   ;;  %v794_v27 = vsel %vm128_vm2, %v1405_v24, %v789_v25  ;;  %s804_s22 = smov 12  ;;  %s1061_s21 = smov 48 }
  0x58   :  { %v1387_v12 = vld [vmem:[%s2648_s0 + $0x10a] ss:$16 sm:%s709_s26]   ;;  %v748_v13 = vsel %vm128_vm2, %v1395_v10, %v743_v11  ;;  %v1399_v29 = vld [vmem:[%s2648_s0 + $0xe] ss:$16 sm:%s763_s28]   ;;  %v761_v30 = vsel %vm118_vm0, %v1398_v28, %v1397_v26  ;;  %s918_s28 = smov 12  ;;  %s1020_s26 = smov 192 }
  0x59   :  { %v1388_v14 = vld [vmem:[%s2648_s0 + $0x10a] ss:$16 sm:%s712_s2]   ;;  %749 = vrot.lane.b32.xlu1 %v748_v13, %s1500_s25  ;;  %v766_v32 = vsel %vm123_vm1, %v1399_v29, %v761_v30  ;;  %s1038_s2 = smov 48 }
  0x5a   :  { %v1389_v15 = vld [vmem:[%s2648_s0 + $0x10a] ss:$16 sm:%s717_s3]   ;;  %v715_v16 = vsel %vm118_vm0, %v1388_v14, %v1387_v12  ;;  %v1400_v31 = vld [vmem:[%s2648_s0 + $0xe] ss:$16 sm:%s768_s4]   ;;  %s869_s3 = smov 3  ;;  %s872_s4 = smov 12 }
  0x5b   :  { %v1390_v17 = vld [vmem:[%s2648_s0 + $0x10a] ss:$16 sm:%s722_s9]   ;;  %v720_v18 = vsel %vm123_vm1, %v1389_v15, %v715_v16  ;;  %s827_s9 = smov 12  ;;  %v1412_v33 = vld [vmem:[%s2648_s0 + $0x18e] ss:$16 sm:%s824_s8]   ;;  %v771_v35 = vsel %vm128_vm2, %v1400_v31, %v766_v32  ;;  %s992_s8 = smov 48 }
  0x5c   :  { %v725_v21 = vsel %vm128_vm2, %v1390_v17, %v720_v18  ;;  %v1413_v34 = vld [vmem:[%s2648_s0 + $0x18e] ss:$16 sm:%s827_s9]   ;;  %v1421_v47 = vld [vmem:[%s2648_s0 + $0x81] ss:$16 sm:%s869_s3]   ;;  %s1043_s9 = smov 192  ;;  %s1089_s3 = smov 192 }
  0x5d   :  { %726 = vrot.lane.b32.xlu0 %v725_v21, %s1500_s25  ;;  %795 = vrot.lane.b32.xlu1 %v794_v27, %s1500_s25  ;;  %v830_v36 = vsel %vm118_vm0, %v1413_v34, %v1412_v33  ;;  %v1414_v37 = vld [vmem:[%s2648_s0 + $0x18e] ss:$16 sm:%s832_s13]   ;;  %s847_s13 = smov 3 }
  0x5e   :  { %v1415_v38 = vld [vmem:[%s2648_s0 + $0x18e] ss:$16 sm:%s837_s14]   ;;  %v835_v39 = vsel %vm123_vm1, %v1414_v37, %v830_v36  ;;  %v1422_v48 = vld [vmem:[%s2648_s0 + $0x81] ss:$16 sm:%s872_s4]   ;;  %s923_s4 = smov 48  ;;  %s895_s14 = smov 12 }
  0x5f   :  { %v1407_v40 = vld [vmem:[%s2648_s0 + $0x10e] ss:$16 sm:%s801_s17]   ;;  %v840_v41 = vsel %vm128_vm2, %v1415_v38, %v835_v39  ;;  %v875_v50 = vsel %vm118_vm0, %v1422_v48, %v1421_v47  ;;  %v1423_v51 = vld [vmem:[%s2648_s0 + $0x81] ss:$16 sm:%s877_s6]   ;;  %s892_s6 = smov 3  ;;  %s1107_s17 = smov 48 }
  0x60   :  { %v1408_v42 = vld [vmem:[%s2648_s0 + $0x10e] ss:$16 sm:%s804_s22]   ;;  %v1424_v52 = vld [vmem:[%s2648_s0 + $0x81] ss:$16 sm:%s882_s10]   ;;  %v880_v53 = vsel %vm123_vm1, %v1423_v51, %v875_v50  ;;  %s941_s10 = smov 12  ;;  %s1066_s22 = smov 192 }
  0x61   :  { %772 = vrot.lane.b32.xlu0 %v771_v35, %s1500_s25  ;;  %v1409_v43 = vld [vmem:[%s2648_s0 + $0x10e] ss:$16 sm:%s809_s23]   ;;  %841 = vrot.lane.b32.xlu1 %v840_v41, %s1500_s25  ;;  %v807_v44 = vsel %vm118_vm0, %v1408_v42, %v1407_v40  ;;  %v885_v55 = vsel %vm128_vm2, %v1424_v52, %v880_v53  ;;  %s961_s23 = smov 3 }
  0x62   :  { %v1410_v45 = vld [vmem:[%s2648_s0 + $0x10e] ss:$16 sm:%s814_s29]   ;;  %v812_v46 = vsel %vm123_vm1, %v1409_v43, %v807_v44  ;;  %v1417_v54 = vld [vmem:[%s2648_s0 + $0x1] ss:$16 sm:%s847_s13]   ;;  %s969_s29 = smov 48  ;;  %s1153_s13 = smov 48 }
  0x63   :  { %v817_v49 = vsel %vm128_vm2, %v1410_v45, %v812_v46  ;;  %v1418_v56 = vld [vmem:[%s2648_s0 + $0x1] ss:$16 sm:%s850_s18]   ;;  %v1441_v11 = vld [vmem:[%s2648_s0 + $0x85] ss:$16 sm:%s961_s23]   ;;  %s1112_s18 = smov 192  ;;  %s1130_s23 = smov 48 }
  0x64   :  { %v1419_v57 = vld [vmem:[%s2648_s0 + $0x1] ss:$16 sm:%s855_s19]   ;;  %v853_v58 = vsel %vm118_vm0, %v1418_v56, %v1417_v54  ;;  %v1443_v15 = vld [vmem:[%s2648_s0 + $0x85] ss:$16 sm:%s969_s29]   ;;  %s1007_s19 = smov 3  ;;  %s984_s29 = smov 3 }
  0x65   :  { %818 = vrot.lane.b32.xlu0 %v817_v49, %s1500_s25  ;;  %886 = vrot.lane.b32.xlu1 %v885_v55, %s1501_s7  ;;  %v1420_v59 = vld [vmem:[%s2648_s0 + $0x1] ss:$16 sm:%s860_s24]   ;;  %v858_v60 = vsel %vm123_vm1, %v1419_v57, %v853_v58  ;;  %s964_s24 = smov 12  ;;  %s1015_s25 = smov 48 }
  0x66   :  { %v1431_v61 = vld [vmem:[%s2648_s0 + $0x181] ss:$16 sm:%s915_s27]   ;;  %v863_v63 = vsel %vm128_vm2, %v1420_v59, %v858_v60  ;;  %v1442_v12 = vld [vmem:[%s2648_s0 + $0x85] ss:$16 sm:%s964_s24]   ;;  %s1084_s27 = smov 48  ;;  %s1181_s24 = smov 192 }
  0x67   :  { %v1432_v62 = vld [vmem:[%s2648_s0 + $0x181] ss:$16 sm:%s918_s28]   ;;  %v967_v14 = vsel %vm118_vm0, %v1442_v12, %v1441_v11  ;;  %v1444_v16 = vld [vmem:[%s2648_s0 + $0x85] ss:$16 sm:%s974_s30]   ;;  %s1033_s30 = smov 12  ;;  %s1135_s28 = smov 192 }
  0x68   :  { %v921_v0 = vsel %vm118_vm0, %v1432_v62, %v1431_v61  ;;  %v1433_v1 = vld [vmem:[%s2648_s0 + $0x181] ss:$16 sm:%s923_s4]   ;;  %s938_s4 = smov 3  ;;  %v972_v17 = vsel %vm123_vm1, %v1443_v15, %v967_v14  ;;  %v1437_v20 = vld [vmem:[%s2648_s0 + $0x5] ss:$16 sm:%s941_s10]   ;;  %s1204_s10 = smov 192 }
  0x69   :  { %v1434_v2 = vld [vmem:[%s2648_s0 + $0x181] ss:$16 sm:%s928_s5]   ;;  %864 = vrot.lane.b32.xlu0 %v863_v63, %s1501_s7  ;;  %v926_v3 = vsel %vm123_vm1, %v1433_v1, %v921_v0  ;;  %v977_v19 = vsel %vm128_vm2, %v1444_v16, %v972_v17  ;;  %s987_s5 = smov 12 }
  0x6a   :  { %v1426_v4 = vld [vmem:[%s2648_s0 + $0x101] ss:$16 sm:%s892_s6]   ;;  %v931_v5 = vsel %vm128_vm2, %v1434_v2, %v926_v3  ;;  %v1436_v18 = vld [vmem:[%s2648_s0 + $0x5] ss:$16 sm:%s938_s4]   ;;  %s1199_s6 = smov 48 }
  0x6b   :  { %v1427_v6 = vld [vmem:[%s2648_s0 + $0x101] ss:$16 sm:%s895_s14]   ;;  %932 = vrot.lane.b32.xlu1 %v931_v5, %s1501_s7  ;;  %v944_v22 = vsel %vm118_vm0, %v1437_v20, %v1436_v18  ;;  %s1158_s14 = smov 192 }
  0x6c   :  { %v1428_v7 = vld [vmem:[%s2648_s0 + $0x101] ss:$16 sm:%s900_s15]   ;;  %v898_v8 = vsel %vm118_vm0, %v1427_v6, %v1426_v4  ;;  %v1438_v21 = vld [vmem:[%s2648_s0 + $0x5] ss:$16 sm:%s946_s11]   ;;  %s1053_s15 = smov 3  ;;  %s1099_s11 = smov 3 }
  0x6d   :  { %v1429_v9 = vld [vmem:[%s2648_s0 + $0x101] ss:$16 sm:%s905_s20]   ;;  %v903_v10 = vsel %vm123_vm1, %v1428_v7, %v898_v8  ;;  %s1010_s20 = smov 12  ;;  %v1439_v23 = vld [vmem:[%s2648_s0 + $0x5] ss:$16 sm:%s951_s16]   ;;  %v949_v24 = vsel %vm123_vm1, %v1438_v21, %v944_v22  ;;  %s1056_s16 = smov 12 }
  0x6e   :  { %v908_v13 = vsel %vm128_vm2, %v1429_v9, %v903_v10  ;;  %v1451_v25 = vld [vmem:[%s2648_s0 + $0x185] ss:$16 sm:%s1007_s19]   ;;  %v954_v27 = vsel %vm128_vm2, %v1439_v23, %v949_v24  ;;  %v1461_v39 = vld [vmem:[%s2648_s0 + $0x89] ss:$16 sm:%s1053_s15]   ;;  %s1176_s19 = smov 48 }
  0x6f   :  { %909 = vrot.lane.b32.xlu0 %v908_v13, %s1501_s7  ;;  %978 = vrot.lane.b32.xlu1 %v977_v19, %s1501_s7  ;;  %v1452_v26 = vld [vmem:[%s2648_s0 + $0x185] ss:$16 sm:%s1010_s20]  }
  0x70   :  { %v1013_v28 = vsel %vm118_vm0, %v1452_v26, %v1451_v25  ;;  %v1453_v29 = vld [vmem:[%s2648_s0 + $0x185] ss:$16 sm:%s1015_s25]   ;;  %s1030_s25 = smov 3  ;;  %v1462_v40 = vld [vmem:[%s2648_s0 + $0x89] ss:$16 sm:%s1056_s16]  }
  0x71   :  { %v1454_v30 = vld [vmem:[%s2648_s0 + $0x185] ss:$16 sm:%s1020_s26]   ;;  %v1018_v31 = vsel %vm123_vm1, %v1453_v29, %v1013_v28  ;;  %v1059_v42 = vsel %vm118_vm0, %v1462_v40, %v1461_v39  ;;  %v1463_v43 = vld [vmem:[%s2648_s0 + $0x89] ss:$16 sm:%s1061_s21]   ;;  %s1076_s21 = smov 3  ;;  %s1079_s26 = smov 12 }
  0x72   :  { %v1446_v32 = vld [vmem:[%s2648_s0 + $0x105] ss:$16 sm:%s984_s29]   ;;  %v1023_v33 = vsel %vm128_vm2, %v1454_v30, %v1018_v31  ;;  %v1464_v44 = vld [vmem:[%s2648_s0 + $0x89] ss:$16 sm:%s1066_s22]   ;;  %v1064_v45 = vsel %vm123_vm1, %v1463_v43, %v1059_v42  ;;  %s1125_s22 = smov 12 }
  0x73   :  { %955 = vrot.lane.b32.xlu0 %v954_v27, %s1501_s7  ;;  %v1447_v34 = vld [vmem:[%s2648_s0 + $0x105] ss:$16 sm:%s987_s5]   ;;  %1024 = vrot.lane.b32.xlu1 %v1023_v33, %s1501_s7  ;;  %v1069_v47 = vsel %vm128_vm2, %v1464_v44, %v1064_v45 }
  0x74   :  { %v1448_v35 = vld [vmem:[%s2648_s0 + $0x105] ss:$16 sm:%s992_s8]   ;;  %v990_v36 = vsel %vm118_vm0, %v1447_v34, %v1446_v32  ;;  %v1456_v46 = vld [vmem:[%s2648_s0 + $0x9] ss:$16 sm:%s1030_s25]   ;;  %s1145_s8 = smov 3 }
  0x75   :  { %v1449_v37 = vld [vmem:[%s2648_s0 + $0x105] ss:$16 sm:%s997_s12]   ;;  %v995_v38 = vsel %vm123_vm1, %v1448_v35, %v990_v36  ;;  %s1102_s12 = smov 12  ;;  %v1457_v48 = vld [vmem:[%s2648_s0 + $0x9] ss:$16 sm:%s1033_s30]  }
  0x76   :  { %v1000_v41 = vsel %vm128_vm2, %v1449_v37, %v995_v38  ;;  %v1458_v49 = vld [vmem:[%s2648_s0 + $0x9] ss:$16 sm:%s1038_s2]   ;;  %v1036_v50 = vsel %vm118_vm0, %v1457_v48, %v1456_v46  ;;  %v1481_v3 = vld [vmem:[%s2648_s0 + $0x8d] ss:$16 sm:%s1145_s8]   ;;  %s1191_s2 = smov 3 }
  0x77   :  { %1001 = vrot.lane.b32.xlu0 %v1000_v41, %s1501_s7  ;;  %1070 = vrot.lane.b32.xlu1 %v1069_v47, %s1501_s7  ;;  %v1459_v51 = vld [vmem:[%s2648_s0 + $0x9] ss:$16 sm:%s1043_s9]   ;;  %v1041_v52 = vsel %vm123_vm1, %v1458_v49, %v1036_v50  ;;  %s1148_s9 = smov 12 }
  0x78   :  { %v1471_v53 = vld [vmem:[%s2648_s0 + $0x189] ss:$16 sm:%s1099_s11]   ;;  %v1046_v55 = vsel %vm128_vm2, %v1459_v51, %v1041_v52  ;;  %v1482_v4 = vld [vmem:[%s2648_s0 + $0x8d] ss:$16 sm:%s1148_s9]   ;;  %v176_v30 = vpop.permute.xlu1 %175  }
  0x79   :  { %v1472_v54 = vld [vmem:[%s2648_s0 + $0x189] ss:$16 sm:%s1102_s12]   ;;  %v1151_v6 = vsel %vm118_vm0, %v1482_v4, %v1481_v3  ;;  %v1483_v7 = vld [vmem:[%s2648_s0 + $0x8d] ss:$16 sm:%s1153_s13]   ;;  %s1168_s13 = smov 3 }
  0x7a   :  { %v1105_v56 = vsel %vm118_vm0, %v1472_v54, %v1471_v53  ;;  %v1473_v57 = vld [vmem:[%s2648_s0 + $0x189] ss:$16 sm:%s1107_s17]   ;;  %s1122_s17 = smov 3  ;;  %v1484_v8 = vld [vmem:[%s2648_s0 + $0x8d] ss:$16 sm:%s1158_s14]   ;;  %v1156_v9 = vsel %vm123_vm1, %v1483_v7, %v1151_v6 }
  0x7b   :  { %v1474_v58 = vld [vmem:[%s2648_s0 + $0x189] ss:$16 sm:%s1112_s18]   ;;  %1047 = vrot.lane.b32.xlu0 %v1046_v55, %s1501_s7  ;;  %v1110_v59 = vsel %vm123_vm1, %v1473_v57, %v1105_v56  ;;  %v1161_v11 = vsel %vm128_vm2, %v1484_v8, %v1156_v9  ;;  %s1171_s18 = smov 12  ;;  %1272 = vst.msk [vmem:[%s2649_s1 + $0x40] sm:$0xff] %vm132_vm4, %v176_v30  }
  0x7c   :  { %v1466_v60 = vld [vmem:[%s2648_s0 + $0x109] ss:$16 sm:%s1076_s21]   ;;  %v1115_v61 = vsel %vm128_vm2, %v1474_v58, %v1110_v59  ;;  %v1476_v10 = vld [vmem:[%s2648_s0 + $0xd] ss:$16 sm:%s1122_s17]   ;;  %v131_v33 = vpop.permute.xlu0 %130  }
  0x7d   :  { %v1467_v62 = vld [vmem:[%s2648_s0 + $0x109] ss:$16 sm:%s1079_s26]   ;;  %1116 = vrot.lane.b32.xlu1 %v1115_v61, %s1501_s7  ;;  %133 = vst.msk [vmem:[%s2649_s1] sm:$0xff] %vm132_vm4, %v131_v33  }
  0x7e   :  { %v1468_v63 = vld [vmem:[%s2648_s0 + $0x109] ss:$16 sm:%s1084_s27]   ;;  %v1082_v0 = vsel %vm118_vm0, %v1467_v62, %v1466_v60  ;;  %v1477_v12 = vld [vmem:[%s2648_s0 + $0xd] ss:$16 sm:%s1125_s22]  }
  0x7f   :  { %v1469_v1 = vld [vmem:[%s2648_s0 + $0x109] ss:$16 sm:%s1089_s3]   ;;  %v1087_v2 = vsel %vm123_vm1, %v1468_v63, %v1082_v0  ;;  %s1194_s3 = smov 12  ;;  %v1478_v13 = vld [vmem:[%s2648_s0 + $0xd] ss:$16 sm:%s1130_s23]   ;;  %v1128_v14 = vsel %vm118_vm0, %v1477_v12, %v1476_v10 }
  0x80   :  { %v1092_v5 = vsel %vm128_vm2, %v1469_v1, %v1087_v2  ;;  %v1479_v15 = vld [vmem:[%s2648_s0 + $0xd] ss:$16 sm:%s1135_s28]   ;;  %v1133_v16 = vsel %vm123_vm1, %v1478_v13, %v1128_v14  ;;  %v199_v34 = vpop.permute.xlu1 %198  }
  0x81   :  { %1093 = vrot.lane.b32.xlu0 %v1092_v5, %s1501_s7  ;;  %1162 = vrot.lane.b32.xlu1 %v1161_v11, %s1501_s7  ;;  %v1491_v17 = vld [vmem:[%s2648_s0 + $0x18d] ss:$16 sm:%s1191_s2]   ;;  %v1138_v19 = vsel %vm128_vm2, %v1479_v15, %v1133_v16 }
  0x82   :  { %v1492_v18 = vld [vmem:[%s2648_s0 + $0x18d] ss:$16 sm:%s1194_s3]   ;;  %1277 = vst.msk [vmem:[%s2649_s1 + $0x60] sm:$0xff] %vm132_vm4, %v199_v34  }
  0x83   :  { %v1197_v20 = vsel %vm118_vm0, %v1492_v18, %v1491_v17  ;;  %v1493_v21 = vld [vmem:[%s2648_s0 + $0x18d] ss:$16 sm:%s1199_s6]  }
  0x84   :  { %v1494_v22 = vld [vmem:[%s2648_s0 + $0x18d] ss:$16 sm:%s1204_s10]   ;;  %v1202_v23 = vsel %vm123_vm1, %v1493_v21, %v1197_v20  ;;  %v153_v35 = vpop.permute.xlu0 %152   ;;  %v245_v36 = vpop.permute.xlu1 %244  }
  0x85   :  { %1139 = vrot.lane.b32.xlu0 %v1138_v19, %s1501_s7  ;;  %v1486_v24 = vld [vmem:[%s2648_s0 + $0x10d] ss:$16 sm:%s1168_s13]   ;;  %v1207_v25 = vsel %vm128_vm2, %v1494_v22, %v1202_v23  ;;  %1267 = vst.msk [vmem:[%s2649_s1 + $0x20] sm:$0xff] %vm132_vm4, %v153_v35  }
  0x86   :  { %v1487_v26 = vld [vmem:[%s2648_s0 + $0x10d] ss:$16 sm:%s1171_s18]   ;;  %1208 = vrot.lane.b32.xlu1 %v1207_v25, %s1501_s7  ;;  %1287 = vst.msk [vmem:[%s2649_s1 + $0x28] sm:$0xff] %vm132_vm4, %v245_v36  }
  0x87   :  { %v1488_v27 = vld [vmem:[%s2648_s0 + $0x10d] ss:$16 sm:%s1176_s19]   ;;  %v1174_v28 = vsel %vm118_vm0, %v1487_v26, %v1486_v24 }
  0x88   :  { %v1489_v29 = vld [vmem:[%s2648_s0 + $0x10d] ss:$16 sm:%s1181_s24]   ;;  %v1179_v31 = vsel %vm123_vm1, %v1488_v27, %v1174_v28  ;;  %v222_v37 = vpop.permute.xlu0 %221  }
  0x89   :  { %v1184_v32 = vsel %vm128_vm2, %v1489_v29, %v1179_v31  ;;  %1282 = vst.msk [vmem:[%s2649_s1 + $0x8] sm:$0xff] %vm132_vm4, %v222_v37  }
  0x8a   :  { %1185 = vrot.lane.b32.xlu0 %v1184_v32, %s1501_s7  ;;  %v291_v38 = vpop.permute.xlu1 %290  }
  0x8b   :  { %1297 = vst.msk [vmem:[%s2649_s1 + $0x68] sm:$0xff] %vm132_vm4, %v291_v38  }
  0x8e   :  { %v268_v39 = vpop.permute.xlu0 %267   ;;  %v337_v40 = vpop.permute.xlu1 %336  }
  0x8f   :  { %1292 = vst.msk [vmem:[%s2649_s1 + $0x48] sm:$0xff] %vm132_vm4, %v268_v39   ;;  %1307 = vst.msk [vmem:[%s2649_s1 + $0x30] sm:$0xff] %vm132_vm4, %v337_v40  }
  0x92   :  { %v314_v41 = vpop.permute.xlu0 %313  }
  0x93   :  { %1302 = vst.msk [vmem:[%s2649_s1 + $0x10] sm:$0xff] %vm132_vm4, %v314_v41  }
  0x95   :  { %v383_v42 = vpop.permute.xlu1 %382  }
  0x96   :  { %1317 = vst.msk [vmem:[%s2649_s1 + $0x70] sm:$0xff] %vm132_vm4, %v383_v42  }
  0x99   :  { %v360_v43 = vpop.permute.xlu0 %359   ;;  %v429_v44 = vpop.permute.xlu1 %428  }
  0x9a   :  { %1312 = vst.msk [vmem:[%s2649_s1 + $0x50] sm:$0xff] %vm132_vm4, %v360_v43   ;;  %1327 = vst.msk [vmem:[%s2649_s1 + $0x38] sm:$0xff] %vm132_vm4, %v429_v44  }
  0x9d   :  { %v406_v45 = vpop.permute.xlu0 %405  }
  0x9e   :  { %1322 = vst.msk [vmem:[%s2649_s1 + $0x18] sm:$0xff] %vm132_vm4, %v406_v45  }
  0xa1   :  { %v475_v46 = vpop.permute.xlu1 %474  }
  0xa2   :  { %1337 = vst.msk [vmem:[%s2649_s1 + $0x78] sm:$0xff] %vm132_vm4, %v475_v46  }
  0xa5   :  { %v452_v47 = vpop.permute.xlu0 %451  }
  0xa6   :  { %1332 = vst.msk [vmem:[%s2649_s1 + $0x58] sm:$0xff] %vm132_vm4, %v452_v47  }
  0xa7   :  { %v520_v48 = vpop.permute.xlu1 %519  }
  0xa8   :  { %1346 = vst.msk [vmem:[%s2649_s1 + $0x20] sm:$0xff] %vm499_vm5, %v520_v48  }
  0xab   :  { %v498_v49 = vpop.permute.xlu0 %497  }
  0xac   :  { %500 = vst.msk [vmem:[%s2649_s1] sm:$0xff] %vm499_vm5, %v498_v49  }
  0xaf   :  { %v566_v50 = vpop.permute.xlu1 %565  }
  0xb0   :  { %1356 = vst.msk [vmem:[%s2649_s1 + $0x60] sm:$0xff] %vm499_vm5, %v566_v50  }
  0xb3   :  { %v543_v51 = vpop.permute.xlu0 %542  }
  0xb4   :  { %1351 = vst.msk [vmem:[%s2649_s1 + $0x40] sm:$0xff] %vm499_vm5, %v543_v51  }
  0xb5   :  { %v612_v52 = vpop.permute.xlu1 %611  }
  0xb6   :  { %1366 = vst.msk [vmem:[%s2649_s1 + $0x28] sm:$0xff] %vm499_vm5, %v612_v52  }
  0xb9   :  { %v589_v53 = vpop.permute.xlu0 %588  }
  0xba   :  { %1361 = vst.msk [vmem:[%s2649_s1 + $0x8] sm:$0xff] %vm499_vm5, %v589_v53  }
  0xbd   :  { %v658_v54 = vpop.permute.xlu1 %657  }
  0xbe   :  { %1376 = vst.msk [vmem:[%s2649_s1 + $0x68] sm:$0xff] %vm499_vm5, %v658_v54  }
  0xc1   :  { %v635_v55 = vpop.permute.xlu0 %634  }
  0xc2   :  { %1371 = vst.msk [vmem:[%s2649_s1 + $0x48] sm:$0xff] %vm499_vm5, %v635_v55  }
  0xc3   :  { %v704_v56 = vpop.permute.xlu1 %703  }
  0xc4   :  { %1386 = vst.msk [vmem:[%s2649_s1 + $0x30] sm:$0xff] %vm499_vm5, %v704_v56  }
  0xc7   :  { %v681_v57 = vpop.permute.xlu0 %680  }
  0xc8   :  { %1381 = vst.msk [vmem:[%s2649_s1 + $0x10] sm:$0xff] %vm499_vm5, %v681_v57  }
  0xcb   :  { %v750_v58 = vpop.permute.xlu1 %749  }
  0xcc   :  { %1396 = vst.msk [vmem:[%s2649_s1 + $0x70] sm:$0xff] %vm499_vm5, %v750_v58  }
  0xcf   :  { %v727_v59 = vpop.permute.xlu0 %726   ;;  %v796_v60 = vpop.permute.xlu1 %795  }
  0xd0   :  { %1391 = vst.msk [vmem:[%s2649_s1 + $0x50] sm:$0xff] %vm499_vm5, %v727_v59   ;;  %1406 = vst.msk [vmem:[%s2649_s1 + $0x38] sm:$0xff] %vm499_vm5, %v796_v60  }
  0xd3   :  { %v773_v61 = vpop.permute.xlu0 %772   ;;  %v842_v62 = vpop.permute.xlu1 %841  }
  0xd4   :  { %1401 = vst.msk [vmem:[%s2649_s1 + $0x18] sm:$0xff] %vm499_vm5, %v773_v61   ;;  %1416 = vst.msk [vmem:[%s2649_s1 + $0x78] sm:$0xff] %vm499_vm5, %v842_v62  }
  0xd7   :  { %v819_v63 = vpop.permute.xlu0 %818   ;;  %v887_v0 = vpop.permute.xlu1 %886  }
  0xd8   :  { %1411 = vst.msk [vmem:[%s2649_s1 + $0x58] sm:$0xff] %vm499_vm5, %v819_v63  }
  0xd9   :  { %1425 = vst.msk [vmem:[%s2649_s1 + $0x20] sm:$0xff] %vm866_vm6, %v887_v0  }
  0xdb   :  { %v865_v1 = vpop.permute.xlu0 %864  }
  0xdc   :  { %867 = vst.msk [vmem:[%s2649_s1] sm:$0xff] %vm866_vm6, %v865_v1  }
  0xdd   :  { %v933_v2 = vpop.permute.xlu1 %932  }
  0xde   :  { %1435 = vst.msk [vmem:[%s2649_s1 + $0x60] sm:$0xff] %vm866_vm6, %v933_v2  }
  0xe1   :  { %v910_v3 = vpop.permute.xlu0 %909   ;;  %v979_v4 = vpop.permute.xlu1 %978  }
  0xe2   :  { %1430 = vst.msk [vmem:[%s2649_s1 + $0x40] sm:$0xff] %vm866_vm6, %v910_v3   ;;  %1445 = vst.msk [vmem:[%s2649_s1 + $0x28] sm:$0xff] %vm866_vm6, %v979_v4  }
  0xe5   :  { %v956_v5 = vpop.permute.xlu0 %955   ;;  %v1025_v6 = vpop.permute.xlu1 %1024  }
  0xe6   :  { %1440 = vst.msk [vmem:[%s2649_s1 + $0x8] sm:$0xff] %vm866_vm6, %v956_v5   ;;  %1455 = vst.msk [vmem:[%s2649_s1 + $0x68] sm:$0xff] %vm866_vm6, %v1025_v6  }
  0xe9   :  { %v1002_v7 = vpop.permute.xlu0 %1001   ;;  %v1071_v8 = vpop.permute.xlu1 %1070  }
  0xea   :  { %1450 = vst.msk [vmem:[%s2649_s1 + $0x48] sm:$0xff] %vm866_vm6, %v1002_v7   ;;  %1465 = vst.msk [vmem:[%s2649_s1 + $0x30] sm:$0xff] %vm866_vm6, %v1071_v8  }
  0xed   :  { %v1048_v9 = vpop.permute.xlu0 %1047  }
  0xee   :  { %1460 = vst.msk [vmem:[%s2649_s1 + $0x10] sm:$0xff] %vm866_vm6, %v1048_v9  }
  0xef   :  { %v1117_v10 = vpop.permute.xlu1 %1116  }
  0xf0   :  { %1475 = vst.msk [vmem:[%s2649_s1 + $0x70] sm:$0xff] %vm866_vm6, %v1117_v10  }
  0xf3   :  { %v1094_v11 = vpop.permute.xlu0 %1093   ;;  %v1163_v12 = vpop.permute.xlu1 %1162  }
  0xf4   :  { %1470 = vst.msk [vmem:[%s2649_s1 + $0x50] sm:$0xff] %vm866_vm6, %v1094_v11   ;;  %1485 = vst.msk [vmem:[%s2649_s1 + $0x38] sm:$0xff] %vm866_vm6, %v1163_v12  }
  0xf7   :  { %v1140_v13 = vpop.permute.xlu0 %1139  }
  0xf8   :  { %1480 = vst.msk [vmem:[%s2649_s1 + $0x18] sm:$0xff] %vm866_vm6, %v1140_v13   ;;  %v1209_v14 = vpop.permute.xlu1 %1208  }
  0xf9   :  { %1495 = vst.msk [vmem:[%s2649_s1 + $0x78] sm:$0xff] %vm866_vm6, %v1209_v14  }
  0xfc   :  { %v1186_v15 = vpop.permute.xlu0 %1185  }
  0xfd   :  { %1490 = vst.msk [vmem:[%s2649_s1 + $0x58] sm:$0xff] %vm866_vm6, %v1186_v15  }

// kernel: model_v0_forward.1
= control target key start
LH: loop header
LB: loop body
LE: loop exit
PB: predicated region body
PF: predicated region fallthrough
CT: control target
= control target key end

     0   :  { %vm103_vm0 = vcmask 261120   ;;  %v734_v17 = vmov 0.0   ;;  %s1214_s0 = inlined_call_operand.vmem [shape: f32[2,128], index: 0, kind: input, shape index: {}]   ;;  %s1215_s1 = inlined_call_operand.vmem [shape: f32[2,32], index: 1, kind: input, shape index: {}]   ;;  %s1216_s2 = inlined_call_operand.vmem [shape: f32[128,512], index: 2, kind: input, shape index: {}]   ;;  %s1217_s3 = inlined_call_operand.vmem [shape: f32[32,512], index: 3, kind: input, shape index: {}]   ;;  %s1218_s4 = inlined_call_operand.vmem [shape: f32[512,16], index: 4, kind: input, shape index: {}]   ;;  %s1219_s5 = inlined_call_operand.hbm [shape: f32[2,16], index: 5, kind: output, shape index: {}]  }
   0x1   :  { %v100_v0 = vld [vmem:[%s1217_s3 + $0x68] sm:$0xff]  ;;  %v102_v1 = vld [vmem:[%s1217_s3 + $0x78] sm:$0xff]  ;;  %v99_v2 = vld [vmem:[%s1217_s3 + $0x60] sm:$0xff]  ;;  %171 = vmatprep.mubr.f32.mxu0 %v734_v17  ;;  %242 = vmatprep.mubr.f32.mxu1 %v734_v17 }
   0x2   :  { %131 = vmatprep.subr.mxu0 %v100_v0  ;;  %202 = vmatprep.subr.mxu1 %v102_v1  ;;  %v101_v3 = vld [vmem:[%s1217_s3 + $0x70] sm:$0xff]  ;;  %v96_v4 = vld [vmem:[%s1217_s3 + $0x48] sm:$0xff]  ;;  %v98_v5 = vld [vmem:[%s1217_s3 + $0x58] sm:$0xff] }
   0x3   :  { %132 = vmatpush1.msra.mxu0 %v99_v2  ;;  %203 = vmatpush1.msra.mxu1 %v101_v3  ;;  %v95_v6 = vld [vmem:[%s1217_s3 + $0x40] sm:$0xff]  ;;  %v97_v7 = vld [vmem:[%s1217_s3 + $0x50] sm:$0xff]  ;;  %v92_v8 = vld [vmem:[%s1217_s3 + $0x28] sm:$0xff] }
   0x4   :  { %133 = vmatprep.subr.mxu0 %v96_v4  ;;  %204 = vmatprep.subr.mxu1 %v98_v5  ;;  %v94_v9 = vld [vmem:[%s1217_s3 + $0x38] sm:$0xff]  ;;  %v91_v10 = vld [vmem:[%s1217_s3 + $0x20] sm:$0xff]  ;;  %v93_v11 = vld [vmem:[%s1217_s3 + $0x30] sm:$0xff] }
   0x5   :  { %134 = vmatpush1.msra.mxu0 %v95_v6  ;;  %205 = vmatpush1.msra.mxu1 %v97_v7  ;;  %v88_v12 = vld [vmem:[%s1217_s3 + $0x8] sm:$0xff]  ;;  %v90_v13 = vld [vmem:[%s1217_s3 + $0x18] sm:$0xff]  ;;  %v87_v14 = vld [vmem:[%s1217_s3] sm:$0xff] }
   0x6   :  { %135 = vmatprep.subr.mxu0 %v92_v8  ;;  %206 = vmatprep.subr.mxu1 %v94_v9  ;;  %v89_v15 = vld [vmem:[%s1217_s3 + $0x10] sm:$0xff]  ;;  %v86_v16 = vld [vmem:[%s1215_s1] sm:$0x3]  ;;  %v83_v18 = vld [vmem:[%s1216_s2 + $0x1e8] sm:$0xff] }
   0x7   :  { %136 = vmatpush1.msra.mxu0 %v91_v10  ;;  %207 = vmatpush1.msra.mxu1 %v93_v11  ;;  %v85_v19 = vld [vmem:[%s1216_s2 + $0x1f8] sm:$0xff]  ;;  %v82_v20 = vld [vmem:[%s1216_s2 + $0x1e0] sm:$0xff]  ;;  %v84_v21 = vld [vmem:[%s1216_s2 + $0x1f0] sm:$0xff] }
   0x8   :  { %137 = vmatprep.subr.mxu0 %v88_v12  ;;  %208 = vmatprep.subr.mxu1 %v90_v13  ;;  %v79_v22 = vld [vmem:[%s1216_s2 + $0x1c8] sm:$0xff]  ;;  %v81_v23 = vld [vmem:[%s1216_s2 + $0x1d8] sm:$0xff]  ;;  %v78_v24 = vld [vmem:[%s1216_s2 + $0x1c0] sm:$0xff] }
   0x9   :  { %138 = vmatpush1.msra.mxu0 %v87_v14  ;;  %209 = vmatpush1.msra.mxu1 %v89_v15  ;;  %v80_v25 = vld [vmem:[%s1216_s2 + $0x1d0] sm:$0xff]  ;;  %v75_v26 = vld [vmem:[%s1216_s2 + $0x1a8] sm:$0xff]  ;;  %v77_v27 = vld [vmem:[%s1216_s2 + $0x1b8] sm:$0xff] }
   0xa   :  { %634 = vmatmul.mubr.msk.f32.vlgmr.msra.gmra.mxu0 %vm103_vm0, %v86_v16  ;;  %635 = vmatmul.mubr.msk.f32.vlgmr.msra.gmra.mxu1 %vm103_vm0, %v86_v16  ;;  %v74_v28 = vld [vmem:[%s1216_s2 + $0x1a0] sm:$0xff]  ;;  %v76_v29 = vld [vmem:[%s1216_s2 + $0x1b0] sm:$0xff]  ;;  %v71_v30 = vld [vmem:[%s1216_s2 + $0x188] sm:$0xff] }
   0xb   :  { %249 = vmatprep.subr.mxu0 %v83_v18  ;;  %320 = vmatprep.subr.mxu1 %v85_v19  ;;  %v73_v31 = vld [vmem:[%s1216_s2 + $0x198] sm:$0xff]  ;;  %v70_v32 = vld [vmem:[%s1216_s2 + $0x180] sm:$0xff]  ;;  %v72_v33 = vld [vmem:[%s1216_s2 + $0x190] sm:$0xff] }
   0xc   :  { %250 = vmatpush1.msra.mxu0 %v82_v20  ;;  %321 = vmatpush1.msra.mxu1 %v84_v21  ;;  %v67_v34 = vld [vmem:[%s1216_s2 + $0x168] sm:$0xff]  ;;  %v69_v35 = vld [vmem:[%s1216_s2 + $0x178] sm:$0xff]  ;;  %v66_v36 = vld [vmem:[%s1216_s2 + $0x160] sm:$0xff] }
   0xd   :  { %251 = vmatprep.subr.mxu0 %v79_v22  ;;  %322 = vmatprep.subr.mxu1 %v81_v23  ;;  %v68_v37 = vld [vmem:[%s1216_s2 + $0x170] sm:$0xff]  ;;  %v63_v38 = vld [vmem:[%s1216_s2 + $0x148] sm:$0xff]  ;;  %v65_v39 = vld [vmem:[%s1216_s2 + $0x158] sm:$0xff] }
   0xe   :  { %252 = vmatpush1.msra.mxu0 %v78_v24  ;;  %323 = vmatpush1.msra.mxu1 %v80_v25  ;;  %v62_v40 = vld [vmem:[%s1216_s2 + $0x140] sm:$0xff]  ;;  %v64_v41 = vld [vmem:[%s1216_s2 + $0x150] sm:$0xff]  ;;  %v59_v42 = vld [vmem:[%s1216_s2 + $0x128] sm:$0xff] }
   0xf   :  { %253 = vmatprep.subr.mxu0 %v75_v26  ;;  %324 = vmatprep.subr.mxu1 %v77_v27  ;;  %v61_v43 = vld [vmem:[%s1216_s2 + $0x138] sm:$0xff]  ;;  %v58_v44 = vld [vmem:[%s1216_s2 + $0x120] sm:$0xff]  ;;  %v60_v45 = vld [vmem:[%s1216_s2 + $0x130] sm:$0xff] }
  0x10   :  { %254 = vmatpush1.msra.mxu0 %v74_v28  ;;  %325 = vmatpush1.msra.mxu1 %v76_v29  ;;  %v55_v46 = vld [vmem:[%s1216_s2 + $0x108] sm:$0xff]  ;;  %v57_v47 = vld [vmem:[%s1216_s2 + $0x118] sm:$0xff]  ;;  %v54_v48 = vld [vmem:[%s1216_s2 + $0x100] sm:$0xff] }
  0x11   :  { %255 = vmatprep.subr.mxu0 %v71_v30  ;;  %326 = vmatprep.subr.mxu1 %v73_v31  ;;  %v56_v49 = vld [vmem:[%s1216_s2 + $0x110] sm:$0xff]  ;;  %v51_v50 = vld [vmem:[%s1216_s2 + $0xe8] sm:$0xff]  ;;  %v53_v51 = vld [vmem:[%s1216_s2 + $0xf8] sm:$0xff] }
  0x12   :  { %256 = vmatpush1.msra.mxu0 %v70_v32  ;;  %327 = vmatpush1.msra.mxu1 %v72_v33  ;;  %v50_v52 = vld [vmem:[%s1216_s2 + $0xe0] sm:$0xff]  ;;  %v52_v53 = vld [vmem:[%s1216_s2 + $0xf0] sm:$0xff]  ;;  %v47_v54 = vld [vmem:[%s1216_s2 + $0xc8] sm:$0xff] }
  0x13   :  { %257 = vmatprep.subr.mxu0 %v67_v34  ;;  %328 = vmatprep.subr.mxu1 %v69_v35  ;;  %v49_v55 = vld [vmem:[%s1216_s2 + $0xd8] sm:$0xff]  ;;  %v46_v56 = vld [vmem:[%s1216_s2 + $0xc0] sm:$0xff]  ;;  %v48_v57 = vld [vmem:[%s1216_s2 + $0xd0] sm:$0xff] }
  0x14   :  { %258 = vmatpush1.msra.mxu0 %v66_v36  ;;  %329 = vmatpush1.msra.mxu1 %v68_v37 }
  0x15   :  { %259 = vmatprep.subr.mxu0 %v63_v38  ;;  %330 = vmatprep.subr.mxu1 %v65_v39 }
  0x16   :  { %260 = vmatpush1.msra.mxu0 %v62_v40  ;;  %331 = vmatpush1.msra.mxu1 %v64_v41 }
  0x17   :  { %261 = vmatprep.subr.mxu0 %v59_v42  ;;  %332 = vmatprep.subr.mxu1 %v61_v43 }
  0x18   :  { %262 = vmatpush1.msra.mxu0 %v58_v44  ;;  %333 = vmatpush1.msra.mxu1 %v60_v45 }
  0x19   :  { %263 = vmatprep.subr.mxu0 %v55_v46  ;;  %334 = vmatprep.subr.mxu1 %v57_v47 }
  0x1a   :  { %264 = vmatpush1.msra.mxu0 %v54_v48  ;;  %335 = vmatpush1.msra.mxu1 %v56_v49 }
  0x1b   :  { %265 = vmatprep.subr.mxu0 %v51_v50  ;;  %336 = vmatprep.subr.mxu1 %v53_v51 }
  0x1c   :  { %10 = vsyncpa [#allocation3], 0  ;;  %266 = vmatpush1.msra.mxu0 %v50_v52  ;;  %337 = vmatpush1.msra.mxu1 %v52_v53  ;;  %v43_v58 = vld [vmem:[%s1216_s2 + $0xa8] sm:$0xff]  ;;  %v45_v59 = vld [vmem:[%s1216_s2 + $0xb8] sm:$0xff]  ;;  %vm607_vm5 = vcmask 123904  }
  0x1d   :  { %267 = vmatprep.subr.mxu0 %v47_v54  ;;  %338 = vmatprep.subr.mxu1 %v49_v55  ;;  %v42_v60 = vld [vmem:[%s1216_s2 + $0xa0] sm:$0xff]  ;;  %v44_v61 = vld [vmem:[%s1216_s2 + $0xb0] sm:$0xff]  ;;  %v39_v62 = vld [vmem:[%s1216_s2 + $0x88] sm:$0xff] }
  0x1e   :  { %268 = vmatpush1.msra.mxu0 %v46_v56  ;;  %339 = vmatpush1.msra.mxu1 %v48_v57  ;;  %v41_v63 = vld [vmem:[%s1216_s2 + $0x98] sm:$0xff]  ;;  %v38_v0 = vld [vmem:[%s1216_s2 + $0x80] sm:$0xff]  ;;  %v40_v1 = vld [vmem:[%s1216_s2 + $0x90] sm:$0xff] }
  0x1f   :  { %269 = vmatprep.subr.mxu0 %v43_v58  ;;  %340 = vmatprep.subr.mxu1 %v45_v59  ;;  %v35_v2 = vld [vmem:[%s1216_s2 + $0x68] sm:$0xff]  ;;  %v37_v3 = vld [vmem:[%s1216_s2 + $0x78] sm:$0xff]  ;;  %v34_v4 = vld [vmem:[%s1216_s2 + $0x60] sm:$0xff] }
  0x20   :  { %270 = vmatpush1.msra.mxu0 %v42_v60  ;;  %341 = vmatpush1.msra.mxu1 %v44_v61  ;;  %v36_v5 = vld [vmem:[%s1216_s2 + $0x70] sm:$0xff]  ;;  %v31_v6 = vld [vmem:[%s1216_s2 + $0x48] sm:$0xff]  ;;  %v33_v7 = vld [vmem:[%s1216_s2 + $0x58] sm:$0xff] }
  0x21   :  { %271 = vmatprep.subr.mxu0 %v39_v62  ;;  %342 = vmatprep.subr.mxu1 %v41_v63  ;;  %v30_v8 = vld [vmem:[%s1216_s2 + $0x40] sm:$0xff]  ;;  %v32_v9 = vld [vmem:[%s1216_s2 + $0x50] sm:$0xff]  ;;  %v27_v10 = vld [vmem:[%s1216_s2 + $0x28] sm:$0xff] }
  0x22   :  { %272 = vmatpush1.msra.mxu0 %v38_v0  ;;  %343 = vmatpush1.msra.mxu1 %v40_v1  ;;  %v29_v11 = vld [vmem:[%s1216_s2 + $0x38] sm:$0xff]  ;;  %v26_v12 = vld [vmem:[%s1216_s2 + $0x20] sm:$0xff]  ;;  %v28_v13 = vld [vmem:[%s1216_s2 + $0x30] sm:$0xff] }
  0x23   :  { %273 = vmatprep.subr.mxu0 %v35_v2  ;;  %344 = vmatprep.subr.mxu1 %v37_v3  ;;  %v23_v14 = vld [vmem:[%s1216_s2 + $0x8] sm:$0xff]  ;;  %v25_v15 = vld [vmem:[%s1216_s2 + $0x18] sm:$0xff]  ;;  %v22_v16 = vld [vmem:[%s1216_s2] sm:$0xff] }
  0x24   :  { %274 = vmatpush1.msra.mxu0 %v34_v4  ;;  %345 = vmatpush1.msra.mxu1 %v36_v5  ;;  %v24_v18 = vld [vmem:[%s1216_s2 + $0x10] sm:$0xff]  ;;  %v21_v19 = vld [vmem:[%s1214_s0] sm:$0x3]  ;;  %v434_v20 = vld [vmem:[%s1218_s4 + $0xf8] sm:$0xff] }
  0x25   :  { %275 = vmatprep.subr.mxu0 %v31_v6  ;;  %346 = vmatprep.subr.mxu1 %v33_v7  ;;  %v466_v21 = vld [vmem:[%s1218_s4 + $0x1f8] sm:$0xff]  ;;  %v433_v23 = vld [vmem:[%s1218_s4 + $0xf0] sm:$0xff]  ;;  %v432_v27 = vld [vmem:[%s1218_s4 + $0xe8] sm:$0xff] }
  0x26   :  { %276 = vmatpush1.msra.mxu0 %v30_v8  ;;  %347 = vmatpush1.msra.mxu1 %v32_v9  ;;  %v418_v22 = vld [vmem:[%s1218_s4 + $0x78] sm:$0xff]  ;;  %v465_v24 = vld [vmem:[%s1218_s4 + $0x1f0] sm:$0xff]  ;;  %v464_v28 = vld [vmem:[%s1218_s4 + $0x1e8] sm:$0xff] }
  0x27   :  { %277 = vmatprep.subr.mxu0 %v27_v10  ;;  %348 = vmatprep.subr.mxu1 %v29_v11  ;;  %v417_v25 = vld [vmem:[%s1218_s4 + $0x70] sm:$0xff]  ;;  %v416_v29 = vld [vmem:[%s1218_s4 + $0x68] sm:$0xff]  ;;  %v431_v31 = vld [vmem:[%s1218_s4 + $0xe0] sm:$0xff] }
  0x28   :  { %278 = vmatpush1.msra.mxu0 %v26_v12  ;;  %349 = vmatpush1.msra.mxu1 %v28_v13  ;;  %v449_v26 = vld [vmem:[%s1218_s4 + $0x170] sm:$0xff]  ;;  %v448_v30 = vld [vmem:[%s1218_s4 + $0x168] sm:$0xff]  ;;  %v463_v32 = vld [vmem:[%s1218_s4 + $0x1e0] sm:$0xff] }
  0x29   :  { %279 = vmatprep.subr.mxu0 %v23_v14  ;;  %350 = vmatprep.subr.mxu1 %v25_v15  ;;  %v415_v33 = vld [vmem:[%s1218_s4 + $0x60] sm:$0xff]  ;;  %v430_v35 = vld [vmem:[%s1218_s4 + $0xd8] sm:$0xff]  ;;  %v429_v39 = vld [vmem:[%s1218_s4 + $0xd0] sm:$0xff] }
  0x2a   :  { %280 = vmatpush1.msra.mxu0 %v22_v16  ;;  %313 = vmatprep.mubr.f32.mxu0 %v734_v17  ;;  %v447_v34 = vld [vmem:[%s1218_s4 + $0x160] sm:$0xff]  ;;  %v462_v36 = vld [vmem:[%s1218_s4 + $0x1d8] sm:$0xff]  ;;  %v461_v40 = vld [vmem:[%s1218_s4 + $0x1d0] sm:$0xff] }
  0x2b   :  { %351 = vmatpush1.msra.mxu1 %v24_v18  ;;  %384 = vmatprep.mubr.f32.mxu1 %v734_v17  ;;  %v450_v17 = vld [vmem:[%s1218_s4 + $0x178] sm:$0xff]  ;;  %v413_v41 = vld [vmem:[%s1218_s4 + $0x50] sm:$0xff]  ;;  %v428_v43 = vld [vmem:[%s1218_s4 + $0xc8] sm:$0xff] }
  0x2c   :  { %314 = vmatmul.mubr.f32.vlgmr.msra.gmra.mxu0 %v21_v19  ;;  %385 = vmatmul.mubr.f32.vlgmr.msra.gmra.mxu1 %v21_v19  ;;  %v414_v37 = vld [vmem:[%s1218_s4 + $0x58] sm:$0xff]  ;;  %v445_v42 = vld [vmem:[%s1218_s4 + $0x150] sm:$0xff]  ;;  %v460_v44 = vld [vmem:[%s1218_s4 + $0x1c8] sm:$0xff] }
  0x2d   :  { %636 = vmatprep.subr.mxu0 %v434_v20  ;;  %671 = vmatprep.subr.mxu1 %v466_v21  ;;  %v446_v38 = vld [vmem:[%s1218_s4 + $0x158] sm:$0xff]  ;;  %v412_v45 = vld [vmem:[%s1218_s4 + $0x48] sm:$0xff]  ;;  %v427_v47 = vld [vmem:[%s1218_s4 + $0xc0] sm:$0xff] }
  0x2e   :  { %637 = vmatpush3.msra.mxu0 %v418_v22  ;;  %672 = vmatpush3.msra.mxu1 %v450_v17  ;;  %v444_v46 = vld [vmem:[%s1218_s4 + $0x148] sm:$0xff]  ;;  %v459_v48 = vld [vmem:[%s1218_s4 + $0x1c0] sm:$0xff]  ;;  %v426_v51 = vld [vmem:[%s1218_s4 + $0xb8] sm:$0xff] }
  0x2f   :  { %638 = vmatprep.subr.mxu0 %v433_v23  ;;  %673 = vmatprep.subr.mxu1 %v465_v24  ;;  %v411_v49 = vld [vmem:[%s1218_s4 + $0x40] sm:$0xff]  ;;  %v458_v52 = vld [vmem:[%s1218_s4 + $0x1b8] sm:$0xff]  ;;  %v425_v55 = vld [vmem:[%s1218_s4 + $0xb0] sm:$0xff] }
  0x30   :  { %639 = vmatpush3.msra.mxu0 %v417_v25  ;;  %674 = vmatpush3.msra.mxu1 %v449_v26  ;;  %v443_v50 = vld [vmem:[%s1218_s4 + $0x140] sm:$0xff]  ;;  %v410_v53 = vld [vmem:[%s1218_s4 + $0x38] sm:$0xff]  ;;  %v457_v56 = vld [vmem:[%s1218_s4 + $0x1b0] sm:$0xff] }
  0x31   :  { %640 = vmatprep.subr.mxu0 %v432_v27  ;;  %675 = vmatprep.subr.mxu1 %v464_v28  ;;  %v442_v54 = vld [vmem:[%s1218_s4 + $0x138] sm:$0xff]  ;;  %v409_v57 = vld [vmem:[%s1218_s4 + $0x30] sm:$0xff]  ;;  %v424_v59 = vld [vmem:[%s1218_s4 + $0xa8] sm:$0xff] }
  0x32   :  { %641 = vmatpush3.msra.mxu0 %v416_v29  ;;  %676 = vmatpush3.msra.mxu1 %v448_v30  ;;  %v441_v58 = vld [vmem:[%s1218_s4 + $0x130] sm:$0xff]  ;;  %v456_v60 = vld [vmem:[%s1218_s4 + $0x1a8] sm:$0xff]  ;;  %v423_v63 = vld [vmem:[%s1218_s4 + $0xa0] sm:$0xff] }
  0x33   :  { %642 = vmatprep.subr.mxu0 %v431_v31  ;;  %677 = vmatprep.subr.mxu1 %v463_v32  ;;  %v408_v61 = vld [vmem:[%s1218_s4 + $0x28] sm:$0xff]  ;;  %v455_v0 = vld [vmem:[%s1218_s4 + $0x1a0] sm:$0xff]  ;;  %v422_v3 = vld [vmem:[%s1218_s4 + $0x98] sm:$0xff] }
  0x34   :  { %643 = vmatpush3.msra.mxu0 %v415_v33  ;;  %678 = vmatpush3.msra.mxu1 %v447_v34  ;;  %v440_v62 = vld [vmem:[%s1218_s4 + $0x128] sm:$0xff]  ;;  %v407_v1 = vld [vmem:[%s1218_s4 + $0x20] sm:$0xff]  ;;  %v454_v4 = vld [vmem:[%s1218_s4 + $0x198] sm:$0xff] }
  0x35   :  { %644 = vmatprep.subr.mxu0 %v430_v35  ;;  %679 = vmatprep.subr.mxu1 %v462_v36  ;;  %v439_v2 = vld [vmem:[%s1218_s4 + $0x120] sm:$0xff]  ;;  %v406_v5 = vld [vmem:[%s1218_s4 + $0x18] sm:$0xff]  ;;  %v421_v7 = vld [vmem:[%s1218_s4 + $0x90] sm:$0xff] }
  0x36   :  { %645 = vmatpush3.msra.mxu0 %v414_v37  ;;  %680 = vmatpush3.msra.mxu1 %v446_v38  ;;  %v438_v6 = vld [vmem:[%s1218_s4 + $0x118] sm:$0xff]  ;;  %v453_v8 = vld [vmem:[%s1218_s4 + $0x190] sm:$0xff]  ;;  %v420_v11 = vld [vmem:[%s1218_s4 + $0x88] sm:$0xff] }
  0x37   :  { %646 = vmatprep.subr.mxu0 %v429_v39  ;;  %681 = vmatprep.subr.mxu1 %v461_v40  ;;  %v405_v9 = vld [vmem:[%s1218_s4 + $0x10] sm:$0xff]  ;;  %v452_v12 = vld [vmem:[%s1218_s4 + $0x188] sm:$0xff]  ;;  %v419_v15 = vld [vmem:[%s1218_s4 + $0x80] sm:$0xff] }
  0x38   :  { %647 = vmatpush3.msra.mxu0 %v413_v41  ;;  %682 = vmatpush3.msra.mxu1 %v445_v42  ;;  %v437_v10 = vld [vmem:[%s1218_s4 + $0x110] sm:$0xff]  ;;  %v404_v13 = vld [vmem:[%s1218_s4 + $0x8] sm:$0xff]  ;;  %v451_v16 = vld [vmem:[%s1218_s4 + $0x180] sm:$0xff] }
  0x39   :  { %648 = vmatprep.subr.mxu0 %v428_v43  ;;  %683 = vmatprep.subr.mxu1 %v460_v44  ;;  %v436_v14 = vld [vmem:[%s1218_s4 + $0x108] sm:$0xff]  ;;  %v403_v18 = vld [vmem:[%s1218_s4] sm:$0xff] }
  0x3a   :  { %649 = vmatpush3.msra.mxu0 %v412_v45  ;;  %684 = vmatpush3.msra.mxu1 %v444_v46  ;;  %v435_v19 = vld [vmem:[%s1218_s4 + $0x100] sm:$0xff]  ;;  %s735_s4 = smov [#allocation2]  }
  0x3b   :  { %650 = vmatprep.subr.mxu0 %v427_v47  ;;  %685 = vmatprep.subr.mxu1 %v459_v48  ;;  %s626_s6 = sshll.u32 %s735_s4, 4  ;;  %s627_s6 = int_to_ptr.vmem [resolvable:$true] %s626_s6 }
  0x3c   :  { %651 = vmatpush3.msra.mxu0 %v411_v49  ;;  %686 = vmatpush3.msra.mxu1 %v443_v50  ;;  %s712_s1 = scalar_lea.vmem %s627_s6, 32  ;;  %p717_p1 = scmp.lt.s32.totalorder %s627_s6, %s627_s6 }
  0x3d   :  { %652 = vmatprep.subr.mxu0 %v426_v51  ;;  %687 = vmatprep.subr.mxu1 %v458_v52  ;;  %p713_p0 = scmp.ne.s32.totalorder %s627_s6, %s712_s1  ;;  %p718_p2 = scmp.lt.s32.totalorder %s712_s1, %s712_s1 }
  0x3e   :  { %653 = vmatpush3.msra.mxu0 %v410_v53  ;;  %688 = vmatpush3.msra.mxu1 %v442_v54 }
  0x3f   :  { %654 = vmatprep.subr.mxu0 %v425_v55  ;;  %689 = vmatprep.subr.mxu1 %v457_v56  ;;  %p719_p3 = por %p718_p2, %p717_p1 }
  0x40   :  { %655 = vmatpush3.msra.mxu0 %v409_v57  ;;  %690 = vmatpush3.msra.mxu1 %v441_v58 }
  0x41   :  { %656 = vmatprep.subr.mxu0 %v424_v59  ;;  %691 = vmatprep.subr.mxu1 %v456_v60  ;;  %p720_p4 = pnand %p719_p3, %p713_p0 }
  0x42   :  { %657 = vmatpush3.msra.mxu0 %v408_v61  ;;  %692 = vmatpush3.msra.mxu1 %v440_v62 }
  0x43   :  { %658 = vmatprep.subr.mxu0 %v423_v63  ;;  %693 = vmatprep.subr.mxu1 %v455_v0 }
  0x44   :  { %659 = vmatpush3.msra.mxu0 %v407_v1  ;;  %694 = vmatpush3.msra.mxu1 %v439_v2 }
  0x45   :  { %660 = vmatprep.subr.mxu0 %v422_v3  ;;  %695 = vmatprep.subr.mxu1 %v454_v4 }
  0x46   :  { %661 = vmatpush3.msra.mxu0 %v406_v5  ;;  %696 = vmatpush3.msra.mxu1 %v438_v6 }
  0x47   :  { %662 = vmatprep.subr.mxu0 %v421_v7  ;;  %697 = vmatprep.subr.mxu1 %v453_v8 }
  0x48   :  { %663 = vmatpush3.msra.mxu0 %v405_v9  ;;  %698 = vmatpush3.msra.mxu1 %v437_v10 }
  0x49   :  { %664 = vmatprep.subr.mxu0 %v420_v11  ;;  %699 = vmatprep.subr.mxu1 %v452_v12 }
  0x4a   :  { %665 = vmatpush3.msra.mxu0 %v404_v13  ;;  %700 = vmatpush3.msra.mxu1 %v436_v14 }
  0x4b   :  { %666 = vmatprep.subr.mxu0 %v419_v15  ;;  %701 = vmatprep.subr.mxu1 %v451_v16 }
  0x4c   :  { %667 = vmatpush3.msra.mxu0 %v403_v18  ;;  %702 = vmatpush3.msra.mxu1 %v435_v19 }
  0xca   :  { %v173_v20 = vpop.f32.mrf.mxu0  ;;  %v244_v21 = vpop.f32.mrf.mxu1 }
  0xcc   :  { %v175_v22 = vpop.f32.mrf.mxu0  ;;  %v246_v17 = vpop.f32.mrf.mxu1 }
  0xec   :  { %v315_v23 = vpop.f32.mrf.mxu0  ;;  %v386_v24 = vpop.f32.mrf.mxu1 }
  0xed   :  { %v316_v25 = vadd.f32 %v315_v23, %v173_v20  ;;  %v387_v26 = vadd.f32 %v386_v24, %v244_v21 }
  0xee   :  { %v317_v27 = vpop.f32.mrf.mxu0  ;;  %v388_v28 = vpop.f32.mrf.mxu1 }
  0xef   :  { %v318_v29 = vadd.f32 %v317_v27, %v175_v22  ;;  %v389_v30 = vadd.f32 %v388_v28, %v246_v17  ;;  %vm391_vm1 = vcmp.gt.f32.partialorder %v316_v25, 0.0  ;;  %v395_v31 = vmul.f32 0.01, %v316_v25 }
  0xf0   :  { %vm393_vm2 = vcmp.gt.f32.partialorder %v387_v26, 0.0  ;;  %v397_v32 = vmul.f32 0.01, %v387_v26 }
  0xf1   :  { %v396_v33 = vmul.f32 0.01, %v318_v29  ;;  %v398_v34 = vmul.f32 0.01, %v389_v30  ;;  %vm392_vm3 = vcmp.gt.f32.partialorder %v318_v29, 0.0  ;;  %vm394_vm4 = vcmp.gt.f32.partialorder %v389_v30, 0.0 }
  0xf2   :  { %v399_v37 = vsel %vm391_vm1, %v316_v25, %v395_v31  ;;  %v401_v38 = vsel %vm393_vm2, %v387_v26, %v397_v32 }
  0xf3   :  { %v400_v35 = vsel %vm392_vm3, %v318_v29, %v396_v33  ;;  %v402_v36 = vsel %vm394_vm4, %v389_v30, %v398_v34 }
  0xf4   :  { %531 = vmatprep.mubr.f32.mxu0 %v400_v35  ;;  %601 = vmatprep.mubr.f32.mxu1 %v402_v36 }
  0xf5   :  { %532 = vmatmul.mubr.f32.vlgmr.msra.gmra.mxu0 %v399_v37  ;;  %602 = vmatmul.mubr.f32.vlgmr.msra.gmra.mxu1 %v401_v38 }
 0x1b5   :  { %v668_v39 = vpop.f32.mrf.mxu0  ;;  %v703_v40 = vpop.f32.mrf.mxu1 }
 0x1b7   :  { %v669_v41 = vpop.f32.mrf.mxu0  ;;  %v704_v42 = vpop.f32.mrf.mxu1 }
 0x1b8   :  { %v670_v43 = vadd.f32 %v669_v41, %v668_v39  ;;  %v705_v44 = vadd.f32 %v704_v42, %v703_v40 }
 0x1ba   :  { %v604_v45 = vadd.f32 %v705_v44, %v670_v43 }
 0x1bc   :  { %v608_v46 = vsel %vm607_vm5, %v604_v45, -inf }
 0x1bd   :  { %609 = vmax.xlane.f32.xlu0 %v608_v46 }
 0x246   :  { %v610_v47 = vpop.xlane.xlu0 %609 }
 0x247   :  { %v611_v48 = vsub.f32 %v604_v45, %v610_v47 }
 0x249   :  { %v612_v49 = vmul.f32 1.442695, %v611_v48 }
 0x24b   :  { %708 = vpow2.f32 %v612_v49 }
 0x258   :  { %v709_v50 = vpop.eup %708 }
 0x259   :  { %v614_v51 = vsel %vm607_vm5, %v709_v50, 0.0 }
 0x25a   :  { %615 = vadd.xlane.f32.xlu0 %v614_v51 }
 0x2e3   :  { %v616_v52 = vpop.xlane.xlu0 %615 }
 0x2e4   :  { %710 = vrcp.f32 %v616_v52 }
 0x2f1   :  { %v711_v53 = vpop.eup %710 }
 0x2f2   :  { %v618_v54 = vmul.f32 %v711_v53, %v709_v50 }
 0x2f4   :  { %619 = vst.msk [vmem:[#allocation2] sm:$0x3] %vm607_vm5, %v618_v54 }
 0x2f5   :  { %723 = shalt.err (!%p720_p4)
}
 0x2f6   :  { %629 = dma.vmem_to_hbm [thread:$0]  %s627_s6, 32, %s1219_s5, [#allocation3]  }
 0x2f7   :  { %732 = dma.done.wait [#allocation3], 32  }
 0x2f8   :  { %733 = vsyncadd [#allocation3], 4294967264 }
 0x2f9   :  { %633 = vsyncpa [#allocation3], 1 }

</bundles_post_ra>
